<compile_context>
chip_gen: v6e
topology: v6e:2x2x1
jax: 0.10.0
libtpu: 0.0.40
codegen_flags: <defaults>
</compile_context>

<pallas_src>
import jax
import jax.numpy as jnp
from jax.experimental import pallas as pl
from jax.experimental.pallas import tpu as pltpu

BN_EPS = 1e-5
GIN_EPS = 0.0        # GINConv eps (default, train_eps=False); 0 -> exact int8 diag fold
NEG_SLOPE = 0.2      # LeakyReLU(0.2)

LANE = 128           # lane width: feature axes padded to multiples of this
SUBLANE = 8


def _leaky_relu(x):
    return jnp.where(x > 0, x, NEG_SLOPE * x)


def _round_up(x, m):
    return ((x + m - 1) // m) * m


def _vmem_capacity_bytes():
    try:
        cap = int(pltpu.get_tpu_info().vmem_capacity_bytes)
        if cap >= (16 << 20):
            return cap
    except Exception:
        pass
    return 64 << 20   # conservative fallback (v7x per-TensorCore VMEM)


def _plan_tiles(n_pad, hp, latp, g_pad):
    """Pick the row compute tile TM and decide whether the int8 adjacency can
    stay fully resident in VMEM (i.e. be fetched from HBM exactly once)."""
    vmem_cap = _vmem_capacity_bytes()
    budget = int(0.8 * vmem_cap)

    # TM-independent residents (x2 on inputs for pipeline double-buffering).
    fixed = (2 * n_pad * hp * 2        # h ping/pong scratch (bf16)
             + g_pad * hp * 4          # pooled scratch (f32)
             + 2 * n_pad * hp * 2      # x0 (bf16, 2 pipeline buffers)
             + 2 * 2 * hp * hp * 2     # w1 + w2 (bf16, 2 buffers each)
             + 2 * 2 * hp * 4          # b1 + b2
             + 2 * hp * latp * 2       # fc weight
             + 2 * latp * 4            # fc bias
             + 2 * g_pad * latp * 4)   # output buffer

    def cost(tm, resident):
        adj = 2 * n_pad * n_pad if resident else 2 * tm * n_pad     # int8 (2 bufs)
        pslab = 2 * g_pad * tm * 2                                  # pmat slab (bf16)
        temps = tm * n_pad * 2 + 2 * tm * hp * 4                    # bf16 cast + f32 temps
        return fixed + adj + pslab + temps

    candidates = [t for t in (512, 256, 128) if n_pad % t == 0] or [n_pad]
    for resident in (True, False):        # prefer keeping adj resident
        for tm in candidates:
            if cost(tm, resident) <= budget:
                return tm, resident, cost(tm, resident), vmem_cap
    tm = candidates[-1]
    return tm, False, cost(tm, False), vmem_cap


def make_gin_kernel(n_layers: int, tm: int, adj_resident: bool):
    """Fused: n_layers x (GIN aggregation + MLP) -> incremental global_add_pool
    -> (BN folded) fc."""

    def kernel(adj_ref, x0_ref, w1_ref, b1_ref, w2_ref, b2_ref,
               pmat_ref, wfc_ref, bfc_ref, out_ref, h_a, h_b, pooled):
        l = pl.program_id(0)              # layer index
        i = pl.program_id(1)              # node-row tile index
        n_row_tiles = pl.num_programs(1)
        row_start = pl.multiple_of(i * tm, tm)
        # With a resident (N_pad, N_pad) adjacency block we slice the row slab
        # ourselves; with a streamed (TM, N_pad) slab the ref already is it.
        adj_row = row_start if adj_resident else 0

        @pl.when((l == 0) & (i == 0))
        def _init():
            pooled[...] = jnp.zeros_like(pooled)

        def layer_step(src_ref, dst_ref):
            # GIN aggregation: the (1+eps) self term (eps = 0) is folded into
            # adj's diagonal on the host, so a single MXU matmul does it all.
            adj_slab = (adj_ref[pl.ds(adj_row, tm), :]
                        .astype(jnp.float32).astype(jnp.bfloat16))
            agg = jnp.dot(adj_slab, src_ref[...],
                          preferred_element_type=jnp.float32)
            # MLP: Linear -> LeakyReLU -> [BN folded into w2/b2] -> Linear -> LeakyReLU
            h = jnp.dot(agg.astype(jnp.bfloat16), w1_ref[0],
                        preferred_element_type=jnp.float32) + b1_ref[0]
            h = _leaky_relu(h)
            h = jnp.dot(h.astype(jnp.bfloat16), w2_ref[0],
                        preferred_element_type=jnp.float32) + b2_ref[0]
            h = _leaky_relu(h)
            # F.dropout between layers is identity in eval mode.
            h_bf = h.astype(jnp.bfloat16)
            dst_ref[pl.ds(row_start, tm), :] = h_bf

            # Incremental global_add_pool: accumulate this tile's contribution
            # during the last layer so pooling hides under the aggregation.
            @pl.when(l == n_layers - 1)
            def _pool():
                pooled[...] += jnp.dot(pmat_ref[...], h_bf,
                                       preferred_element_type=jnp.float32)

        # Layer 0 reads x0 directly (no seed copy); afterwards h ping-pongs.
        @pl.when(l == 0)
        def _l0():
            layer_step(x0_ref, h_b)

        if n_layers > 1:
            @pl.when(l % 2 == 1)
            def _odd():
                layer_step(h_b, h_a)

            @pl.when((l > 0) & (l % 2 == 0))
            def _even():
                layer_step(h_a, h_b)

        # Epilogue on the very last grid step: folded-BN fc on pooled embeddings.
        # NOTE: `pooled` receives its final tile contribution earlier in this
        # same grid step; stateful ref ordering guarantees the read sees it.
        @pl.when((l == n_layers - 1) & (i == n_row_tiles - 1))
        def _fc():
            out_ref[...] = jnp.dot(pooled[...].astype(jnp.bfloat16), wfc_ref[...],
                                   preferred_element_type=jnp.float32) + bfc_ref[...]

    return kernel


# ----------------------------- host-side glue ------------------------------

def _fold_bn_into_linear(w, b, gamma, beta, mean, var):
    """z = BN_eval(h) @ w + b  ==>  z = h @ w' + b'."""
    s = gamma / jnp.sqrt(var + BN_EPS)
    t = beta - mean * s
    return w * s[:, None], b + t @ w


def _pad2(a, rows, cols, dtype):
    out = jnp.zeros((rows, cols), dtype)
    return out.at[:a.shape[0], :a.shape[1]].set(a.astype(dtype))


def gin_forward(x, edge_index, batch, num_graphs, convs, head):
    """Equivalent of GIN.forward(data) with data = (x, edge_index, batch), eval mode."""
    N, F = x.shape
    n_layers = len(convs)
    H = convs[0]["w2"].shape[1]
    latent = head["wfc"].shape[1]

    HP = _round_up(max(F, H), LANE)        # shared padded feature width (lane-dense)
    LATP = _round_up(latent, LANE)
    N_pad = _round_up(N, LANE)
    G_pad = _round_up(num_graphs, SUBLANE)

    TM, adj_resident, vmem_needed, vmem_cap = _plan_tiles(N_pad, HP, LATP, G_pad)
    n_row_tiles = N_pad // TM

    # int8 adjacency (A[i, j] = #edges j->i) built directly in its compressed
    # dtype, with the GIN self term (1 + eps, eps = 0 so exactly 1) folded into
    # the diagonal.  int8 halves the HBM stream / VMEM footprint vs bf16.
    # TODO(synk): for large sparse graphs, a CSR + scalar-prefetch gather path
    # would replace this dense O(N^2) adjacency (and int8 overflows if an edge
    # multiplicity exceeds 127).
    src, dst = edge_index[0], edge_index[1]
    node = jnp.arange(N, dtype=jnp.int32)
    adj = (jnp.zeros((N_pad, N_pad), jnp.int8)
           .at[dst, src].add(jnp.ones(src.shape, jnp.int8))
           .at[node, node].add(jnp.ones((N,), jnp.int8)))

    # One-hot pool matrix, streamed as (G_pad, TM) column slabs for the
    # incremental global_add_pool during the last layer.
    pmat = (jnp.zeros((G_pad, N_pad), jnp.bfloat16)
            .at[batch, node].set(jnp.ones((N,), jnp.bfloat16)))
    x0 = _pad2(x, N_pad, HP, jnp.bfloat16)

    # Per-layer MLP params: fold BN (eval) into the second Linear, zero-pad to
    # lane-dense (HP, HP) tiles, stack along a leading layer axis so one
    # BlockSpec streams layer l's weights at grid step l.
    w1s, b1s, w2s, b2s = [], [], [], []
    for p in convs:
        w2f, b2f = _fold_bn_into_linear(p["w2"], p["b2"], p["gamma"],
                                        p["beta"], p["mean"], p["var"])
        w1s.append(_pad2(p["w1"], HP, HP, jnp.bfloat16))
        b1s.append(_pad2(p["b1"][None, :], 1, HP, jnp.float32))
        w2s.append(_pad2(w2f, HP, HP, jnp.bfloat16))
        b2s.append(_pad2(b2f[None, :], 1, HP, jnp.float32))
    w1s = jnp.stack(w1s)                   # [L, HP, HP] bf16
    b1s = jnp.stack(b1s)                   # [L, 1,  HP] f32
    w2s = jnp.stack(w2s)
    b2s = jnp.stack(b2s)

    wfcf, bfcf = _fold_bn_into_linear(head["wfc"], head["bfc"], head["gamma"],
                                      head["beta"], head["mean"], head["var"])
    wfc = _pad2(wfcf, HP, LATP, jnp.bfloat16)
    bfc = _pad2(bfcf[None, :], 1, LATP, jnp.float32)

    # Adjacency BlockSpec: resident (fetched once) if it fits, else streamed.
    adj_spec = (pl.BlockSpec((N_pad, N_pad), lambda l, i: (0, 0)) if adj_resident
                else pl.BlockSpec((TM, N_pad), lambda l, i: (i, 0)))

    # Advisory cost estimate for XLA scheduling around the custom call.
    flops = int(2 * n_layers * (N_pad * N_pad * HP + 2 * N_pad * HP * HP)
                + 2 * G_pad * N_pad * HP + 2 * G_pad * HP * LATP)
    adj_reads = 1 if adj_resident else n_layers
    bytes_accessed = int(adj_reads * N_pad * N_pad
                         + N_pad * HP * 2
                         + n_layers * (2 * HP * HP * 2 + 2 * HP * 4)
                         + n_layers * G_pad * N_pad * 2
                         + HP * LATP * 2 + G_pad * LATP * 4)

    vmem_limit = int(min(0.9 * vmem_cap, max(vmem_needed + (8 << 20), 32 << 20)))

    out_pad = pl.pallas_call(
        make_gin_kernel(n_layers, TM, adj_resident),
        out_shape=jax.ShapeDtypeStruct((G_pad, LATP), jnp.float32),
        grid_spec=pltpu.PrefetchScalarGridSpec(
            num_scalar_prefetch=0,
            grid=(n_layers, n_row_tiles),
            in_specs=[
                adj_spec,                                            # adjacency (int8)
                pl.BlockSpec((N_pad, HP), lambda l, i: (0, 0)),      # x0 (layer-0 input)
                pl.BlockSpec((1, HP, HP), lambda l, i: (l, 0, 0)),   # w1 per layer
                pl.BlockSpec((1, 1, HP), lambda l, i: (l, 0, 0)),    # b1 per layer
                pl.BlockSpec((1, HP, HP), lambda l, i: (l, 0, 0)),   # w2 (BN folded)
                pl.BlockSpec((1, 1, HP), lambda l, i: (l, 0, 0)),    # b2 (BN folded)
                pl.BlockSpec((G_pad, TM), lambda l, i: (0, i)),      # pmat column slab
                pl.BlockSpec((HP, LATP), lambda l, i: (0, 0)),       # fc weight (BN folded)
                pl.BlockSpec((1, LATP), lambda l, i: (0, 0)),        # fc bias (BN folded)
            ],
            out_specs=pl.BlockSpec((G_pad, LATP), lambda l, i: (0, 0)),
            scratch_shapes=[pltpu.VMEM((N_pad, HP), jnp.bfloat16),   # h ping
                            pltpu.VMEM((N_pad, HP), jnp.bfloat16),   # h pong
                            pltpu.VMEM((G_pad, HP), jnp.float32)],   # pooled accumulator
        ),
        # Both grid axes carry scratch state (h ping-pong, pooled accumulator),
        # so they must stay sequential ("arbitrary") on a single TensorCore.
        # TODO(synk): on v7x, split the row axis across the 2 TensorCores with
        # an h exchange (CMEM/VMEM_SHARED) at each layer boundary for ~2x.
        compiler_params=pltpu.CompilerParams(
            dimension_semantics=("arbitrary", "arbitrary"),
            vmem_limit_bytes=vmem_limit),
        cost_estimate=pl.CostEstimate(flops=flops, transcendentals=0,
                                      bytes_accessed=bytes_accessed),
    )(adj, x0, w1s, b1s, w2s, b2s, pmat, wfc, bfc)

    return out_pad[:num_graphs, :latent]


# ----------------------- params + pure-JAX reference -----------------------

def init_params(key, input_dim, hidden_dim, latent_dim, n_layers):
    convs = []
    din = input_dim
    for _ in range(n_layers):
        key, k1, k2, k3, k4, k5, k6, k7, k8 = jax.random.split(key, 9)
        convs.append(dict(
            w1=jax.random.normal(k1, (din, hidden_dim), jnp.float32) * 0.1,
            b1=jax.random.normal(k2, (hidden_dim,), jnp.float32) * 0.01,
            w2=jax.random.normal(k3, (hidden_dim, hidden_dim), jnp.float32) * 0.1,
            b2=jax.random.normal(k4, (hidden_dim,), jnp.float32) * 0.01,
            gamma=1.0 + 0.1 * jax.random.normal(k5, (hidden_dim,), jnp.float32),
            beta=0.1 * jax.random.normal(k6, (hidden_dim,), jnp.float32),
            mean=0.1 * jax.random.normal(k7, (hidden_dim,), jnp.float32),
            var=jax.random.uniform(k8, (hidden_dim,), jnp.float32, 0.5, 1.5),
        ))
        din = hidden_dim
    key, k1, k2, k3, k4, k5, k6 = jax.random.split(key, 7)
    head = dict(
        gamma=1.0 + 0.1 * jax.random.normal(k1, (hidden_dim,), jnp.float32),
        beta=0.1 * jax.random.normal(k2, (hidden_dim,), jnp.float32),
        mean=0.1 * jax.random.normal(k3, (hidden_dim,), jnp.float32),
        var=jax.random.uniform(k4, (hidden_dim,), jnp.float32, 0.5, 1.5),
        wfc=jax.random.normal(k5, (hidden_dim, latent_dim), jnp.float32) * 0.1,
        bfc=jax.random.normal(k6, (latent_dim,), jnp.float32) * 0.01,
    )
    return convs, head


def gin_reference(x, edge_index, batch, num_graphs, convs, head):
    """Pure-JAX f32 reference (un-fused, BN not folded) for correctness check."""
    N = x.shape[0]
    adj = jnp.zeros((N, N), jnp.float32).at[edge_index[1], edge_index[0]].add(1.0)
    pmat = jnp.zeros((num_graphs, N), jnp.float32).at[batch, jnp.arange(N)].set(1.0)
    h = x
    for p in convs:
        agg = (1.0 + GIN_EPS) * h + adj @ h
        z = agg @ p["w1"] + p["b1"]
        z = _leaky_relu(z)
        z = (z - p["mean"]) / jnp.sqrt(p["var"] + BN_EPS) * p["gamma"] + p["beta"]
        z = z @ p["w2"] + p["b2"]
        h = _leaky_relu(z)
    pooled = pmat @ h
    pooled = (pooled - head["mean"]) / jnp.sqrt(head["var"] + BN_EPS) * head["gamma"] + head["beta"]
    return pooled @ head["wfc"] + head["bfc"]


if __name__ == "__main__":
    # Small shapes consistent with the module.
    input_dim, hidden_dim, latent_dim, n_layers = 16, 32, 8, 2
    nodes_per_graph, num_graphs = 16, 2
    N = nodes_per_graph * num_graphs

    key = jax.random.PRNGKey(0)
    k_x, k_params = jax.random.split(key)

    # Node features.
    x = jax.random.normal(k_x, (N, input_dim), jnp.float32)

    # Deterministic graph: directed ring within each graph, made symmetric.
    src = jnp.arange(N, dtype=jnp.int32)
    dst = (src + 1) % nodes_per_graph + (src // nodes_per_graph) * nodes_per_graph
    edge_index = jnp.stack([jnp.concatenate([src, dst]),
                            jnp.concatenate([dst, src])])          # [2, 2N]
    batch = jnp.arange(N, dtype=jnp.int32) // nodes_per_graph       # [N]

    convs, head = init_params(k_params, input_dim, hidden_dim, latent_dim, n_layers)

    out = gin_forward(x, edge_index, batch, num_graphs, convs, head)
    out = jax.block_until_ready(out)
    assert out.shape == (num_graphs, latent_dim), out.shape
    assert bool(jnp.all(jnp.isfinite(out)))

    # Check against the f32 reference (generous tolerance: bf16 weights/activations).
    ref = gin_reference(x, edge_index, batch, num_graphs, convs, head)
    err = float(jnp.max(jnp.abs(out - ref)))
    tol = 5e-2 * (1.0 + float(jnp.max(jnp.abs(ref))))
    assert err < tol, (err, tol)
    print("KERNEL_OK")
</pallas_src>

<mosaic_0001>
module attributes {stable_mosaic.version = 11 : i64} {
  func.func @kernel(%arg0: i32, %arg1: i32, %arg2: memref<128x128xi8, #tpu.memory_space<vmem>>, %arg3: memref<128x128xbf16, #tpu.memory_space<vmem>>, %arg4: memref<1x128x128xbf16, #tpu.memory_space<vmem>>, %arg5: memref<1x1x128xf32, #tpu.memory_space<vmem>>, %arg6: memref<1x128x128xbf16, #tpu.memory_space<vmem>>, %arg7: memref<1x1x128xf32, #tpu.memory_space<vmem>>, %arg8: memref<8x128xbf16, #tpu.memory_space<vmem>>, %arg9: memref<128x128xbf16, #tpu.memory_space<vmem>>, %arg10: memref<1x128xf32, #tpu.memory_space<vmem>>, %arg11: memref<8x128xf32, #tpu.memory_space<vmem>>, %arg12: memref<128x128xbf16, #tpu.memory_space<vmem>>, %arg13: memref<128x128xbf16, #tpu.memory_space<vmem>>, %arg14: memref<8x128xf32, #tpu.memory_space<vmem>>) attributes {dimension_semantics = [#tpu.dimension_semantics<arbitrary>, #tpu.dimension_semantics<arbitrary>], iteration_bounds = array<i64: 2, 1>, scalar_prefetch = 0 : i64, scratch_operands = 3 : i64, tpu.core_type = #tpu.core_type<tc>, window_params = [{pipeline_mode = #tpu.pipeline_mode<synchronous>, transform_indices = @transform_0, window_bounds = array<i64: 128, 128>}, {pipeline_mode = #tpu.pipeline_mode<synchronous>, transform_indices = @transform_1, window_bounds = array<i64: 128, 128>}, {transform_indices = @transform_2, window_bounds = array<i64: 1, 128, 128>}, {transform_indices = @transform_3, window_bounds = array<i64: 1, 1, 128>}, {transform_indices = @transform_4, window_bounds = array<i64: 1, 128, 128>}, {transform_indices = @transform_5, window_bounds = array<i64: 1, 1, 128>}, {transform_indices = @transform_6, window_bounds = array<i64: 8, 128>}, {pipeline_mode = #tpu.pipeline_mode<synchronous>, transform_indices = @transform_7, window_bounds = array<i64: 128, 128>}, {pipeline_mode = #tpu.pipeline_mode<synchronous>, transform_indices = @transform_8, window_bounds = array<i64: 1, 128>}, {pipeline_mode = #tpu.pipeline_mode<synchronous>, transform_indices = @transform_9, window_bounds = array<i64: 8, 128>}]} {
    %c128_i32 = arith.constant 128 : i32
    %0 = arith.muli %arg1, %c128_i32 : i32
    %1 = tpu.assume_multiple %0, 128 : i32
    %c0_i32 = arith.constant 0 : i32
    %2 = arith.cmpi eq, %arg0, %c0_i32 : i32
    %c0_i32_0 = arith.constant 0 : i32
    %3 = arith.cmpi eq, %arg1, %c0_i32_0 : i32
    %4 = arith.andi %2, %3 : i1
    %5 = arith.extui %4 : i1 to i32
    %c0_i32_1 = arith.constant 0 : i32
    %6 = arith.cmpi ne, %5, %c0_i32_1 : i32
    scf.if %6 {
      %cst = arith.constant 0.000000e+00 : f32
      %43 = vector.broadcast %cst : f32 to vector<8x128xf32>
      %c0 = arith.constant 0 : index
      %c0_22 = arith.constant 0 : index
      %44 = vector.load %arg14[%c0, %c0_22] : memref<8x128xf32, #tpu.memory_space<vmem>>, vector<8x128xf32>
      tpu.vector_store %arg14[%c0, %c0_22], %43 {strides = array<i32>} : memref<8x128xf32, #tpu.memory_space<vmem>>, vector<8x128xf32>,
    } else {
    }
    %c0_i32_2 = arith.constant 0 : i32
    %7 = arith.cmpi eq, %arg0, %c0_i32_2 : i32
    %8 = arith.extui %7 : i1 to i32
    %c0_i32_3 = arith.constant 0 : i32
    %9 = arith.cmpi ne, %8, %c0_i32_3 : i32
    scf.if %9 {
      %43 = arith.index_cast %1 : i32 to index
      %c0 = arith.constant 0 : index
      %44 = vector.load %arg2[%43, %c0] : memref<128x128xi8, #tpu.memory_space<vmem>>, vector<128x128xi8>
      %45 = arith.sitofp %44 : vector<128x128xi8> to vector<128x128xf32>
      %46 = arith.truncf %45 : vector<128x128xf32> to vector<128x128xbf16>
      %c0_22 = arith.constant 0 : index
      %c0_23 = arith.constant 0 : index
      %47 = vector.load %arg3[%c0_22, %c0_23] : memref<128x128xbf16, #tpu.memory_space<vmem>>, vector<128x128xbf16>
      %cst = arith.constant dense<0.000000e+00> : vector<128x128xf32>
      %48 = tpu.matmul %46, %47, %cst {dimension_numbers = #tpu.dot_dimension_numbers<[1], [0], [0], [1], [0, 0, 1, 1], [], []>} : vector<128x128xbf16>, vector<128x128xbf16>, vector<128x128xf32> -> vector<128x128xf32>
      %49 = arith.truncf %48 : vector<128x128xf32> to vector<128x128xbf16>
      %c0_24 = arith.constant 0 : index
      %c0_25 = arith.constant 0 : index
      %c0_26 = arith.constant 0 : index
      %50 = vector.load %arg4[%c0_24, %c0_25, %c0_26] : memref<1x128x128xbf16, #tpu.memory_space<vmem>>, vector<1x128x128xbf16>
      %51 = vector.shape_cast %50 : vector<1x128x128xbf16> to vector<128x128xbf16>
      %cst_27 = arith.constant dense<0.000000e+00> : vector<128x128xf32>
      %52 = tpu.matmul %49, %51, %cst_27 {dimension_numbers = #tpu.dot_dimension_numbers<[1], [0], [0], [1], [0, 0, 1, 1], [], []>} : vector<128x128xbf16>, vector<128x128xbf16>, vector<128x128xf32> -> vector<128x128xf32>
      %c0_28 = arith.constant 0 : index
      %c0_29 = arith.constant 0 : index
      %c0_30 = arith.constant 0 : index
      %53 = vector.load %arg5[%c0_28, %c0_29, %c0_30] : memref<1x1x128xf32, #tpu.memory_space<vmem>>, vector<1x1x128xf32>
      %54 = vector.shape_cast %53 : vector<1x1x128xf32> to vector<1x128xf32>
      %55 = vector.broadcast %54 : vector<1x128xf32> to vector<128x128xf32>
      %56 = arith.addf %52, %55 : vector<128x128xf32>
      %cst_31 = arith.constant 0.000000e+00 : f32
      %57 = vector.broadcast %cst_31 : f32 to vector<128x128xf32>
      %58 = arith.cmpf ogt, %56, %57 : vector<128x128xf32>
      %cst_32 = arith.constant 2.000000e-01 : f32
      %59 = vector.broadcast %cst_32 : f32 to vector<128x128xf32>
      %60 = arith.mulf %59, %56 : vector<128x128xf32>
      %61 = arith.select %58, %56, %60 : vector<128x128xi1>, vector<128x128xf32>
      %62 = arith.truncf %61 : vector<128x128xf32> to vector<128x128xbf16>
      %c0_33 = arith.constant 0 : index
      %c0_34 = arith.constant 0 : index
      %c0_35 = arith.constant 0 : index
      %63 = vector.load %arg6[%c0_33, %c0_34, %c0_35] : memref<1x128x128xbf16, #tpu.memory_space<vmem>>, vector<1x128x128xbf16>
      %64 = vector.shape_cast %63 : vector<1x128x128xbf16> to vector<128x128xbf16>
      %cst_36 = arith.constant dense<0.000000e+00> : vector<128x128xf32>
      %65 = tpu.matmul %62, %64, %cst_36 {dimension_numbers = #tpu.dot_dimension_numbers<[1], [0], [0], [1], [0, 0, 1, 1], [], []>} : vector<128x128xbf16>, vector<128x128xbf16>, vector<128x128xf32> -> vector<128x128xf32>
      %c0_37 = arith.constant 0 : index
      %c0_38 = arith.constant 0 : index
      %c0_39 = arith.constant 0 : index
      %66 = vector.load %arg7[%c0_37, %c0_38, %c0_39] : memref<1x1x128xf32, #tpu.memory_space<vmem>>, vector<1x1x128xf32>
      %67 = vector.shape_cast %66 : vector<1x1x128xf32> to vector<1x128xf32>
      %68 = vector.broadcast %67 : vector<1x128xf32> to vector<128x128xf32>
      %69 = arith.addf %65, %68 : vector<128x128xf32>
      %cst_40 = arith.constant 0.000000e+00 : f32
      %70 = vector.broadcast %cst_40 : f32 to vector<128x128xf32>
      %71 = arith.cmpf ogt, %69, %70 : vector<128x128xf32>
      %cst_41 = arith.constant 2.000000e-01 : f32
      %72 = vector.broadcast %cst_41 : f32 to vector<128x128xf32>
      %73 = arith.mulf %72, %69 : vector<128x128xf32>
      %74 = arith.select %71, %69, %73 : vector<128x128xi1>, vector<128x128xf32>
      %75 = arith.truncf %74 : vector<128x128xf32> to vector<128x128xbf16>
      %76 = arith.index_cast %1 : i32 to index
      %c0_42 = arith.constant 0 : index
      %77 = vector.load %arg13[%76, %c0_42] : memref<128x128xbf16, #tpu.memory_space<vmem>>, vector<128x128xbf16>
      tpu.vector_store %arg13[%76, %c0_42], %75 {strides = array<i32>} : memref<128x128xbf16, #tpu.memory_space<vmem>>, vector<128x128xbf16>,
      %c1_i32_43 = arith.constant 1 : i32
      %78 = arith.cmpi eq, %arg0, %c1_i32_43 : i32
      %79 = arith.extui %78 : i1 to i32
      %c0_i32_44 = arith.constant 0 : i32
      %80 = arith.cmpi ne, %79, %c0_i32_44 : i32
      scf.if %80 {
        %c0_45 = arith.constant 0 : index
        %c0_46 = arith.constant 0 : index
        %81 = vector.load %arg14[%c0_45, %c0_46] : memref<8x128xf32, #tpu.memory_space<vmem>>, vector<8x128xf32>
        %c0_47 = arith.constant 0 : index
        %c0_48 = arith.constant 0 : index
        %82 = vector.load %arg8[%c0_47, %c0_48] : memref<8x128xbf16, #tpu.memory_space<vmem>>, vector<8x128xbf16>
        %cst_49 = arith.constant dense<0.000000e+00> : vector<8x128xf32>
        %83 = tpu.matmul %82, %75, %cst_49 {dimension_numbers = #tpu.dot_dimension_numbers<[1], [0], [0], [1], [0, 0, 1, 1], [], []>} : vector<8x128xbf16>, vector<128x128xbf16>, vector<8x128xf32> -> vector<8x128xf32>
        %84 = arith.addf %81, %83 : vector<8x128xf32>
        %c0_50 = arith.constant 0 : index
        %c0_51 = arith.constant 0 : index
        %85 = vector.load %arg14[%c0_50, %c0_51] : memref<8x128xf32, #tpu.memory_space<vmem>>, vector<8x128xf32>
        tpu.vector_store %arg14[%c0_50, %c0_51], %84 {strides = array<i32>} : memref<8x128xf32, #tpu.memory_space<vmem>>, vector<8x128xf32>,
      } else {
      }
    } else {
    }
    %c2_i32 = arith.constant 2 : i32
    %c0_i32_4 = arith.constant 0 : i32
    %10 = arith.cmpi eq, %c2_i32, %c0_i32_4 : i32
    %c1_i32 = arith.constant 1 : i32
    %11 = arith.select %10, %c1_i32, %c2_i32 : i32
    %12 = arith.remsi %arg0, %11 : i32
    %c0_i32_5 = arith.constant 0 : i32
    %13 = arith.cmpi ne, %12, %c0_i32_5 : i32
    %c0_i32_6 = arith.constant 0 : i32
    %14 = arith.cmpi slt, %12, %c0_i32_6 : i32
    %c0_i32_7 = arith.constant 0 : i32
    %15 = arith.cmpi slt, %11, %c0_i32_7 : i32
    %16 = arith.xori %14, %15 : i1
    %17 = arith.andi %16, %13 : i1
    %18 = arith.addi %12, %11 : i32
    %19 = arith.select %17, %18, %12 : i32
    %c1_i32_8 = arith.constant 1 : i32
    %20 = arith.cmpi eq, %19, %c1_i32_8 : i32
    %21 = arith.extui %20 : i1 to i32
    %c0_i32_9 = arith.constant 0 : i32
    %22 = arith.cmpi ne, %21, %c0_i32_9 : i32
    scf.if %22 {
      %43 = arith.index_cast %1 : i32 to index
      %c0 = arith.constant 0 : index
      %44 = vector.load %arg2[%43, %c0] : memref<128x128xi8, #tpu.memory_space<vmem>>, vector<128x128xi8>
      %45 = arith.sitofp %44 : vector<128x128xi8> to vector<128x128xf32>
      %46 = arith.truncf %45 : vector<128x128xf32> to vector<128x128xbf16>
      %c0_22 = arith.constant 0 : index
      %c0_23 = arith.constant 0 : index
      %47 = vector.load %arg13[%c0_22, %c0_23] : memref<128x128xbf16, #tpu.memory_space<vmem>>, vector<128x128xbf16>
      %cst = arith.constant dense<0.000000e+00> : vector<128x128xf32>
      %48 = tpu.matmul %46, %47, %cst {dimension_numbers = #tpu.dot_dimension_numbers<[1], [0], [0], [1], [0, 0, 1, 1], [], []>} : vector<128x128xbf16>, vector<128x128xbf16>, vector<128x128xf32> -> vector<128x128xf32>
      %49 = arith.truncf %48 : vector<128x128xf32> to vector<128x128xbf16>
      %c0_24 = arith.constant 0 : index
      %c0_25 = arith.constant 0 : index
      %c0_26 = arith.constant 0 : index
      %50 = vector.load %arg4[%c0_24, %c0_25, %c0_26] : memref<1x128x128xbf16, #tpu.memory_space<vmem>>, vector<1x128x128xbf16>
      %51 = vector.shape_cast %50 : vector<1x128x128xbf16> to vector<128x128xbf16>
      %cst_27 = arith.constant dense<0.000000e+00> : vector<128x128xf32>
      %52 = tpu.matmul %49, %51, %cst_27 {dimension_numbers = #tpu.dot_dimension_numbers<[1], [0], [0], [1], [0, 0, 1, 1], [], []>} : vector<128x128xbf16>, vector<128x128xbf16>, vector<128x128xf32> -> vector<128x128xf32>
      %c0_28 = arith.constant 0 : index
      %c0_29 = arith.constant 0 : index
      %c0_30 = arith.constant 0 : index
      %53 = vector.load %arg5[%c0_28, %c0_29, %c0_30] : memref<1x1x128xf32, #tpu.memory_space<vmem>>, vector<1x1x128xf32>
      %54 = vector.shape_cast %53 : vector<1x1x128xf32> to vector<1x128xf32>
      %55 = vector.broadcast %54 : vector<1x128xf32> to vector<128x128xf32>
      %56 = arith.addf %52, %55 : vector<128x128xf32>
      %cst_31 = arith.constant 0.000000e+00 : f32
      %57 = vector.broadcast %cst_31 : f32 to vector<128x128xf32>
      %58 = arith.cmpf ogt, %56, %57 : vector<128x128xf32>
      %cst_32 = arith.constant 2.000000e-01 : f32
      %59 = vector.broadcast %cst_32 : f32 to vector<128x128xf32>
      %60 = arith.mulf %59, %56 : vector<128x128xf32>
      %61 = arith.select %58, %56, %60 : vector<128x128xi1>, vector<128x128xf32>
      %62 = arith.truncf %61 : vector<128x128xf32> to vector<128x128xbf16>
      %c0_33 = arith.constant 0 : index
      %c0_34 = arith.constant 0 : index
      %c0_35 = arith.constant 0 : index
      %63 = vector.load %arg6[%c0_33, %c0_34, %c0_35] : memref<1x128x128xbf16, #tpu.memory_space<vmem>>, vector<1x128x128xbf16>
      %64 = vector.shape_cast %63 : vector<1x128x128xbf16> to vector<128x128xbf16>
      %cst_36 = arith.constant dense<0.000000e+00> : vector<128x128xf32>
      %65 = tpu.matmul %62, %64, %cst_36 {dimension_numbers = #tpu.dot_dimension_numbers<[1], [0], [0], [1], [0, 0, 1, 1], [], []>} : vector<128x128xbf16>, vector<128x128xbf16>, vector<128x128xf32> -> vector<128x128xf32>
      %c0_37 = arith.constant 0 : index
      %c0_38 = arith.constant 0 : index
      %c0_39 = arith.constant 0 : index
      %66 = vector.load %arg7[%c0_37, %c0_38, %c0_39] : memref<1x1x128xf32, #tpu.memory_space<vmem>>, vector<1x1x128xf32>
      %67 = vector.shape_cast %66 : vector<1x1x128xf32> to vector<1x128xf32>
      %68 = vector.broadcast %67 : vector<1x128xf32> to vector<128x128xf32>
      %69 = arith.addf %65, %68 : vector<128x128xf32>
      %cst_40 = arith.constant 0.000000e+00 : f32
      %70 = vector.broadcast %cst_40 : f32 to vector<128x128xf32>
      %71 = arith.cmpf ogt, %69, %70 : vector<128x128xf32>
      %cst_41 = arith.constant 2.000000e-01 : f32
      %72 = vector.broadcast %cst_41 : f32 to vector<128x128xf32>
      %73 = arith.mulf %72, %69 : vector<128x128xf32>
      %74 = arith.select %71, %69, %73 : vector<128x128xi1>, vector<128x128xf32>
      %75 = arith.truncf %74 : vector<128x128xf32> to vector<128x128xbf16>
      %76 = arith.index_cast %1 : i32 to index
      %c0_42 = arith.constant 0 : index
      %77 = vector.load %arg12[%76, %c0_42] : memref<128x128xbf16, #tpu.memory_space<vmem>>, vector<128x128xbf16>
      tpu.vector_store %arg12[%76, %c0_42], %75 {strides = array<i32>} : memref<128x128xbf16, #tpu.memory_space<vmem>>, vector<128x128xbf16>,
      %c1_i32_43 = arith.constant 1 : i32
      %78 = arith.cmpi eq, %arg0, %c1_i32_43 : i32
      %79 = arith.extui %78 : i1 to i32
      %c0_i32_44 = arith.constant 0 : i32
      %80 = arith.cmpi ne, %79, %c0_i32_44 : i32
      scf.if %80 {
        %c0_45 = arith.constant 0 : index
        %c0_46 = arith.constant 0 : index
        %81 = vector.load %arg14[%c0_45, %c0_46] : memref<8x128xf32, #tpu.memory_space<vmem>>, vector<8x128xf32>
        %c0_47 = arith.constant 0 : index
        %c0_48 = arith.constant 0 : index
        %82 = vector.load %arg8[%c0_47, %c0_48] : memref<8x128xbf16, #tpu.memory_space<vmem>>, vector<8x128xbf16>
        %cst_49 = arith.constant dense<0.000000e+00> : vector<8x128xf32>
        %83 = tpu.matmul %82, %75, %cst_49 {dimension_numbers = #tpu.dot_dimension_numbers<[1], [0], [0], [1], [0, 0, 1, 1], [], []>} : vector<8x128xbf16>, vector<128x128xbf16>, vector<8x128xf32> -> vector<8x128xf32>
        %84 = arith.addf %81, %83 : vector<8x128xf32>
        %c0_50 = arith.constant 0 : index
        %c0_51 = arith.constant 0 : index
        %85 = vector.load %arg14[%c0_50, %c0_51] : memref<8x128xf32, #tpu.memory_space<vmem>>, vector<8x128xf32>
        tpu.vector_store %arg14[%c0_50, %c0_51], %84 {strides = array<i32>} : memref<8x128xf32, #tpu.memory_space<vmem>>, vector<8x128xf32>,
      } else {
      }
    } else {
    }
    %c0_i32_10 = arith.constant 0 : i32
    %23 = arith.cmpi sgt, %arg0, %c0_i32_10 : i32
    %c2_i32_11 = arith.constant 2 : i32
    %c0_i32_12 = arith.constant 0 : i32
    %24 = arith.cmpi eq, %c2_i32_11, %c0_i32_12 : i32
    %c1_i32_13 = arith.constant 1 : i32
    %25 = arith.select %24, %c1_i32_13, %c2_i32_11 : i32
    %26 = arith.remsi %arg0, %25 : i32
    %c0_i32_14 = arith.constant 0 : i32
    %27 = arith.cmpi ne, %26, %c0_i32_14 : i32
    %c0_i32_15 = arith.constant 0 : i32
    %28 = arith.cmpi slt, %26, %c0_i32_15 : i32
    %c0_i32_16 = arith.constant 0 : i32
    %29 = arith.cmpi slt, %25, %c0_i32_16 : i32
    %30 = arith.xori %28, %29 : i1
    %31 = arith.andi %30, %27 : i1
    %32 = arith.addi %26, %25 : i32
    %33 = arith.select %31, %32, %26 : i32
    %c0_i32_17 = arith.constant 0 : i32
    %34 = arith.cmpi eq, %33, %c0_i32_17 : i32
    %35 = arith.andi %23, %34 : i1
    %36 = arith.extui %35 : i1 to i32
    %c0_i32_18 = arith.constant 0 : i32
    %37 = arith.cmpi ne, %36, %c0_i32_18 : i32
    scf.if %37 {
      %43 = arith.index_cast %1 : i32 to index
      %c0 = arith.constant 0 : index
      %44 = vector.load %arg2[%43, %c0] : memref<128x128xi8, #tpu.memory_space<vmem>>, vector<128x128xi8>
      %45 = arith.sitofp %44 : vector<128x128xi8> to vector<128x128xf32>
      %46 = arith.truncf %45 : vector<128x128xf32> to vector<128x128xbf16>
      %c0_22 = arith.constant 0 : index
      %c0_23 = arith.constant 0 : index
      %47 = vector.load %arg12[%c0_22, %c0_23] : memref<128x128xbf16, #tpu.memory_space<vmem>>, vector<128x128xbf16>
      %cst = arith.constant dense<0.000000e+00> : vector<128x128xf32>
      %48 = tpu.matmul %46, %47, %cst {dimension_numbers = #tpu.dot_dimension_numbers<[1], [0], [0], [1], [0, 0, 1, 1], [], []>} : vector<128x128xbf16>, vector<128x128xbf16>, vector<128x128xf32> -> vector<128x128xf32>
      %49 = arith.truncf %48 : vector<128x128xf32> to vector<128x128xbf16>
      %c0_24 = arith.constant 0 : index
      %c0_25 = arith.constant 0 : index
      %c0_26 = arith.constant 0 : index
      %50 = vector.load %arg4[%c0_24, %c0_25, %c0_26] : memref<1x128x128xbf16, #tpu.memory_space<vmem>>, vector<1x128x128xbf16>
      %51 = vector.shape_cast %50 : vector<1x128x128xbf16> to vector<128x128xbf16>
      %cst_27 = arith.constant dense<0.000000e+00> : vector<128x128xf32>
      %52 = tpu.matmul %49, %51, %cst_27 {dimension_numbers = #tpu.dot_dimension_numbers<[1], [0], [0], [1], [0, 0, 1, 1], [], []>} : vector<128x128xbf16>, vector<128x128xbf16>, vector<128x128xf32> -> vector<128x128xf32>
      %c0_28 = arith.constant 0 : index
      %c0_29 = arith.constant 0 : index
      %c0_30 = arith.constant 0 : index
      %53 = vector.load %arg5[%c0_28, %c0_29, %c0_30] : memref<1x1x128xf32, #tpu.memory_space<vmem>>, vector<1x1x128xf32>
      %54 = vector.shape_cast %53 : vector<1x1x128xf32> to vector<1x128xf32>
      %55 = vector.broadcast %54 : vector<1x128xf32> to vector<128x128xf32>
      %56 = arith.addf %52, %55 : vector<128x128xf32>
      %cst_31 = arith.constant 0.000000e+00 : f32
      %57 = vector.broadcast %cst_31 : f32 to vector<128x128xf32>
      %58 = arith.cmpf ogt, %56, %57 : vector<128x128xf32>
      %cst_32 = arith.constant 2.000000e-01 : f32
      %59 = vector.broadcast %cst_32 : f32 to vector<128x128xf32>
      %60 = arith.mulf %59, %56 : vector<128x128xf32>
      %61 = arith.select %58, %56, %60 : vector<128x128xi1>, vector<128x128xf32>
      %62 = arith.truncf %61 : vector<128x128xf32> to vector<128x128xbf16>
      %c0_33 = arith.constant 0 : index
      %c0_34 = arith.constant 0 : index
      %c0_35 = arith.constant 0 : index
      %63 = vector.load %arg6[%c0_33, %c0_34, %c0_35] : memref<1x128x128xbf16, #tpu.memory_space<vmem>>, vector<1x128x128xbf16>
      %64 = vector.shape_cast %63 : vector<1x128x128xbf16> to vector<128x128xbf16>
      %cst_36 = arith.constant dense<0.000000e+00> : vector<128x128xf32>
      %65 = tpu.matmul %62, %64, %cst_36 {dimension_numbers = #tpu.dot_dimension_numbers<[1], [0], [0], [1], [0, 0, 1, 1], [], []>} : vector<128x128xbf16>, vector<128x128xbf16>, vector<128x128xf32> -> vector<128x128xf32>
      %c0_37 = arith.constant 0 : index
      %c0_38 = arith.constant 0 : index
      %c0_39 = arith.constant 0 : index
      %66 = vector.load %arg7[%c0_37, %c0_38, %c0_39] : memref<1x1x128xf32, #tpu.memory_space<vmem>>, vector<1x1x128xf32>
      %67 = vector.shape_cast %66 : vector<1x1x128xf32> to vector<1x128xf32>
      %68 = vector.broadcast %67 : vector<1x128xf32> to vector<128x128xf32>
      %69 = arith.addf %65, %68 : vector<128x128xf32>
      %cst_40 = arith.constant 0.000000e+00 : f32
      %70 = vector.broadcast %cst_40 : f32 to vector<128x128xf32>
      %71 = arith.cmpf ogt, %69, %70 : vector<128x128xf32>
      %cst_41 = arith.constant 2.000000e-01 : f32
      %72 = vector.broadcast %cst_41 : f32 to vector<128x128xf32>
      %73 = arith.mulf %72, %69 : vector<128x128xf32>
      %74 = arith.select %71, %69, %73 : vector<128x128xi1>, vector<128x128xf32>
      %75 = arith.truncf %74 : vector<128x128xf32> to vector<128x128xbf16>
      %76 = arith.index_cast %1 : i32 to index
      %c0_42 = arith.constant 0 : index
      %77 = vector.load %arg13[%76, %c0_42] : memref<128x128xbf16, #tpu.memory_space<vmem>>, vector<128x128xbf16>
      tpu.vector_store %arg13[%76, %c0_42], %75 {strides = array<i32>} : memref<128x128xbf16, #tpu.memory_space<vmem>>, vector<128x128xbf16>,
      %c1_i32_43 = arith.constant 1 : i32
      %78 = arith.cmpi eq, %arg0, %c1_i32_43 : i32
      %79 = arith.extui %78 : i1 to i32
      %c0_i32_44 = arith.constant 0 : i32
      %80 = arith.cmpi ne, %79, %c0_i32_44 : i32
      scf.if %80 {
        %c0_45 = arith.constant 0 : index
        %c0_46 = arith.constant 0 : index
        %81 = vector.load %arg14[%c0_45, %c0_46] : memref<8x128xf32, #tpu.memory_space<vmem>>, vector<8x128xf32>
        %c0_47 = arith.constant 0 : index
        %c0_48 = arith.constant 0 : index
        %82 = vector.load %arg8[%c0_47, %c0_48] : memref<8x128xbf16, #tpu.memory_space<vmem>>, vector<8x128xbf16>
        %cst_49 = arith.constant dense<0.000000e+00> : vector<8x128xf32>
        %83 = tpu.matmul %82, %75, %cst_49 {dimension_numbers = #tpu.dot_dimension_numbers<[1], [0], [0], [1], [0, 0, 1, 1], [], []>} : vector<8x128xbf16>, vector<128x128xbf16>, vector<8x128xf32> -> vector<8x128xf32>
        %84 = arith.addf %81, %83 : vector<8x128xf32>
        %c0_50 = arith.constant 0 : index
        %c0_51 = arith.constant 0 : index
        %85 = vector.load %arg14[%c0_50, %c0_51] : memref<8x128xf32, #tpu.memory_space<vmem>>, vector<8x128xf32>
        tpu.vector_store %arg14[%c0_50, %c0_51], %84 {strides = array<i32>} : memref<8x128xf32, #tpu.memory_space<vmem>>, vector<8x128xf32>,
      } else {
      }
    } else {
    }
    %c1_i32_19 = arith.constant 1 : i32
    %38 = arith.cmpi eq, %arg0, %c1_i32_19 : i32
    %c0_i32_20 = arith.constant 0 : i32
    %39 = arith.cmpi eq, %arg1, %c0_i32_20 : i32
    %40 = arith.andi %38, %39 : i1
    %41 = arith.extui %40 : i1 to i32
    %c0_i32_21 = arith.constant 0 : i32
    %42 = arith.cmpi ne, %41, %c0_i32_21 : i32
    scf.if %42 {
      %c0 = arith.constant 0 : index
      %c0_22 = arith.constant 0 : index
      %43 = vector.load %arg14[%c0, %c0_22] : memref<8x128xf32, #tpu.memory_space<vmem>>, vector<8x128xf32>
      %44 = arith.truncf %43 : vector<8x128xf32> to vector<8x128xbf16>
      %c0_23 = arith.constant 0 : index
      %c0_24 = arith.constant 0 : index
      %45 = vector.load %arg9[%c0_23, %c0_24] : memref<128x128xbf16, #tpu.memory_space<vmem>>, vector<128x128xbf16>
      %cst = arith.constant dense<0.000000e+00> : vector<8x128xf32>
      %46 = tpu.matmul %44, %45, %cst {dimension_numbers = #tpu.dot_dimension_numbers<[1], [0], [0], [1], [0, 0, 1, 1], [], []>} : vector<8x128xbf16>, vector<128x128xbf16>, vector<8x128xf32> -> vector<8x128xf32>
      %c0_25 = arith.constant 0 : index
      %c0_26 = arith.constant 0 : index
      %47 = vector.load %arg10[%c0_25, %c0_26] : memref<1x128xf32, #tpu.memory_space<vmem>>, vector<1x128xf32>
      %48 = vector.broadcast %47 : vector<1x128xf32> to vector<8x128xf32>
      %49 = arith.addf %46, %48 : vector<8x128xf32>
      %c0_27 = arith.constant 0 : index
      %c0_28 = arith.constant 0 : index
      %50 = vector.load %arg11[%c0_27, %c0_28] : memref<8x128xf32, #tpu.memory_space<vmem>>, vector<8x128xf32>
      tpu.vector_store %arg11[%c0_27, %c0_28], %49 {strides = array<i32>} : memref<8x128xf32, #tpu.memory_space<vmem>>, vector<8x128xf32>,
    } else {
    }
    return
  }
  func.func @transform_0(%arg0: i32, %arg1: i32) -> (i32, i32) {
    %c0_i32 = arith.constant 0 : i32
    %c0_i32_0 = arith.constant 0 : i32
    %c0_i32_1 = arith.constant 0 : i32
    return %c0_i32, %c0_i32_0 : i32, i32
  }
  func.func @transform_1(%arg0: i32, %arg1: i32) -> (i32, i32) {
    %c0_i32 = arith.constant 0 : i32
    %c0_i32_0 = arith.constant 0 : i32
    %c0_i32_1 = arith.constant 0 : i32
    return %c0_i32, %c0_i32_0 : i32, i32
  }
  func.func @transform_2(%arg0: i32, %arg1: i32) -> (i32, i32, i32) {
    %c0_i32 = arith.constant 0 : i32
    %c0_i32_0 = arith.constant 0 : i32
    %c0_i32_1 = arith.constant 0 : i32
    return %arg0, %c0_i32, %c0_i32_0 : i32, i32, i32
  }
  func.func @transform_3(%arg0: i32, %arg1: i32) -> (i32, i32, i32) {
    %c0_i32 = arith.constant 0 : i32
    %c0_i32_0 = arith.constant 0 : i32
    %c0_i32_1 = arith.constant 0 : i32
    return %arg0, %c0_i32, %c0_i32_0 : i32, i32, i32
  }
  func.func @transform_4(%arg0: i32, %arg1: i32) -> (i32, i32, i32) {
    %c0_i32 = arith.constant 0 : i32
    %c0_i32_0 = arith.constant 0 : i32
    %c0_i32_1 = arith.constant 0 : i32
    return %arg0, %c0_i32, %c0_i32_0 : i32, i32, i32
  }
  func.func @transform_5(%arg0: i32, %arg1: i32) -> (i32, i32, i32) {
    %c0_i32 = arith.constant 0 : i32
    %c0_i32_0 = arith.constant 0 : i32
    %c0_i32_1 = arith.constant 0 : i32
    return %arg0, %c0_i32, %c0_i32_0 : i32, i32, i32
  }
  func.func @transform_6(%arg0: i32, %arg1: i32) -> (i32, i32) {
    %c0_i32 = arith.constant 0 : i32
    %c0_i32_0 = arith.constant 0 : i32
    return %c0_i32, %arg1 : i32, i32
  }
  func.func @transform_7(%arg0: i32, %arg1: i32) -> (i32, i32) {
    %c0_i32 = arith.constant 0 : i32
    %c0_i32_0 = arith.constant 0 : i32
    %c0_i32_1 = arith.constant 0 : i32
    return %c0_i32, %c0_i32_0 : i32, i32
  }
  func.func @transform_8(%arg0: i32, %arg1: i32) -> (i32, i32) {
    %c0_i32 = arith.constant 0 : i32
    %c0_i32_0 = arith.constant 0 : i32
    %c0_i32_1 = arith.constant 0 : i32
    return %c0_i32, %c0_i32_0 : i32, i32
  }
  func.func @transform_9(%arg0: i32, %arg1: i32) -> (i32, i32) {
    %c0_i32 = arith.constant 0 : i32
    %c0_i32_0 = arith.constant 0 : i32
    %c0_i32_1 = arith.constant 0 : i32
    return %c0_i32, %c0_i32_0 : i32, i32
  }
}

</mosaic_0001>

<bundles_post_ra>
// kernel: tpu_custom_call.1
= control target key start
LH: loop header
LB: loop body
LE: loop exit
PB: predicated region body
PF: predicated region fallthrough
CT: control target
= control target key end

     0   :  { %s4938_s0 = inlined_call_operand.hbm [shape: s8[128,128], index: 0, kind: input, shape index: {}]   ;;  %s4939_s1 = inlined_call_operand.hbm [shape: bf16[128,128], index: 1, kind: input, shape index: {}]   ;;  %s4940_s2 = inlined_call_operand.hbm [shape: bf16[2,128,128], index: 2, kind: input, shape index: {}]   ;;  %s4941_s3 = inlined_call_operand.vmem [shape: f32[2,1,128], index: 3, kind: input, shape index: {}]   ;;  %s4942_s4 = inlined_call_operand.hbm [shape: bf16[2,128,128], index: 4, kind: input, shape index: {}]   ;;  %s4943_s5 = inlined_call_operand.vmem [shape: f32[2,1,128], index: 5, kind: input, shape index: {}]   ;;  %s4944_s6 = inlined_call_operand.vmem [shape: bf16[8,128], index: 6, kind: input, shape index: {}]   ;;  %s4945_s7 = inlined_call_operand.hbm [shape: bf16[128,128], index: 7, kind: input, shape index: {}]   ;;  %s4946_s8 = inlined_call_operand.vmem [shape: f32[1,128], index: 8, kind: input, shape index: {}]   ;;  %s4947_s9 = inlined_call_operand.hbm [shape: f32[8,128], index: 9, kind: output, shape index: {}]  }
   0x1   :  { %4957 = sst [smem:[#allocation22_spill]] %s4938_s0 }
   0x2   :  { %4958 = sst [smem:[#allocation23_spill]] %s4939_s1 }
   0x3   :  { %4959 = sst [smem:[#allocation24_spill]] %s4940_s2 }
   0x4   :  { %4960 = sst [smem:[#allocation25_spill]] %s4946_s8 }
   0x5   :  { %4961 = sst [smem:[#allocation26_spill]] %s4947_s9 }
   0x6   :  { %14 = vsyncpa [#allocation6], 0 }
   0x7   :  { %15 = vsyncpa [#allocation9], 0 }
   0x8   :  { %16 = vsyncpa [#allocation7], 0  ;;  %s4500_s30 = smov 0   ;;  %s4502_s10 = smov 0  }
   0x9   :  { %s4504_s11 = smov 0   ;;  %s4506_s12 = smov 0  }
   0xa   :  { %s4508_s13 = smov 0   ;;  %s4510_s14 = smov 0  }
   0xb LB: > { %4962 = sst [smem:[#allocation19_spill]] %s4425_s13  ;;  %s4529_s15 = sadd.s32 4294967295, %s4429_s14   ;;  %s4429_s14 = sphi %s4510_s14, %s22_s14   ;;  %s4425_s13 = sphi %s4508_s13, %s4987_s13   ;;  %s4421_s12 = sphi %s4506_s12, %s4986_s12   ;;  %s4417_s11 = sphi %s4504_s11, %s4990_s11   ;;  %s4413_s10 = sphi %s4502_s10, %s4989_s10   ;;  %s4409_s30 = sphi %s4500_s30, %s4988_s30  }
   0xc   : > { %4963 = sst [smem:[#allocation20_spill]] %s4429_s14  ;;  %p90_p0 = scmp.ne.s32.totalorder %s4417_s11, %s4413_s10 }
   0xd   : > { %p91_p1 = scmp.eq.s32.totalorder %s4429_s14, 0  ;;  %p96_p2 = scmp.ne.s32.totalorder %s4413_s10, %s4409_s30 }
   0xe   : > { %p4948_p3 = scmp.eq.s32.totalorder %s4529_s15, 0  ;;  %p3058_p5 = scmp.ge.s32.totalorder %s4429_s14, 1 }
   0xf   : > { %p92_p4 = por %p91_p1, %p90_p0  ;;  %p274_p7 = scmp.lt.s32.totalorder %s4429_s14, 3 }
  0x10   : > { %p4540_p6 = por %p4948_p3, %p96_p2  ;;  %s4431_s19 = smov [#allocation5]  }
  0x11   : > { %p4545_p8 = pnand %p3058_p5, %p274_p7  ;;  %s286_s20 = sshll.u32 %s4431_s19, 4  ;;  %s287_s20 = int_to_ptr.vmem [resolvable:$true] %s286_s20 }
  0x12   : > { %s4964_s17 = scalar_select %p4540_p6, 1, 0 }
  0x13   : > { %p4034_p9 = pneg %p4545_p8  ;;  %p4054_p10 = scmp.lt.s32.totalorder %s4429_s14, 2 }
  0x14   : > { %s4432_s23 = smov [#allocation8]   ;;  %s4216_s25 = scalar_lea.vmem %s287_s20, 512 }
  0x15   : > { %p4554_p11 = pnand %p4034_p9, %p4948_p3  ;;  %p4558_p12 = pnand %p4054_p10, %p92_p4 }
  0x16   : > { %s299_s24 = sshll.u32 %s4432_s23, 4  ;;  %p4217_p0 = scmp.ne.s32.totalorder %s287_s20, %s4216_s25  ;;  %s300_s24 = int_to_ptr.vmem [resolvable:$true] %s299_s24 }
  0x17   : > { %p4207_p13 = pneg %p4554_p11  ;;  %p4224_p5 = scmp.lt.s32.totalorder %s287_s20, %s287_s20 }
  0x18   : > { %p4225_p7 = scmp.lt.s32.totalorder %s4216_s25, %s4216_s25 }
  0x19   : > { %p4219_p1 = pnand %p4217_p0, %p4207_p13 }
  0x1a   : > { %p4226_p9 = por %p4225_p7, %p4224_p5 }
  0x1b   : > { %p4220_p2 = pneg %p4219_p1 }
  0x1d   : > { %p4227_p3 = pnand %p4226_p9, %p4220_p2 }
  0x1f   : > { %4230 = shalt.err (!%p4227_p3)
}
  0x20   : > { %s4433_s26 = smov 128   ;;  %s4434_s27 = smov 8  }
  0x21   : > { %s4968_s0 = sld [smem:[#allocation22_spill]]  ;;  %s4242_s30 = scalar_lea.vmem %s300_s24, 1024 }
  0x22   : > { %p4243_p4 = scmp.ne.s32.totalorder %s300_s24, %s4242_s30  ;;  %p4250_p1 = scmp.lt.s32.totalorder %s300_s24, %s300_s24 }
  0x23   : > { %p4251_p6 = scmp.lt.s32.totalorder %s4242_s30, %s4242_s30 }
  0x24   : > { %p4245_p10 = pnand %p4243_p4, %p4207_p13 }
  0x25   : > { %p4252_p5 = por %p4251_p6, %p4250_p1 }
  0x26   : > { %p4246_p0 = pneg %p4245_p10 }
  0x27   : > { %4037 = dma.hbm_to_vmem [thread:$0]  (!%p4554_p11), %s4968_s0, 512, %s287_s20, [#allocation6], %s4433_s26, %s4433_s26, %s4434_s27  }
  0x28   : > { %p4253_p2 = pnand %p4252_p5, %p4246_p0 }
  0x2a   : > { %4256 = shalt.err (!%p4253_p2)
}
  0x2b   : > { %s4950_s19 = smov 64   ;;  %s4952_s23 = smov 4  }
  0x2c   : > { %s4969_s1 = sld [smem:[#allocation23_spill]]  ;;  %s336_s26 = sand.u32 1, %s4429_s14  }
  0x2d   : > { %s34_s27 = sadd.s32 1, %s4425_s13  ;;  %s338_s28 = sand.u32 1, %s4417_s11  }
  0x2e   : > { %p36_p3 = scmp.ge.s32.totalorder %s34_s27, 2  ;;  %s4586_s29 = sshll.u32 %s338_s28, 6 }
  0x2f   : > { %s3225_s30 = sshll.u32 %s4425_s13, 10  ;;  %s4971_s2 = sld [smem:[#allocation24_spill]] }
  0x30   : > { %s4992_s27 = smov (%p36_p3, %s34_s27), 0  ;;  %s340_s20 = scalar_lea.vmem [#allocation10], %s4586_s29 }
  0x31   : > { %4970 = sst [smem:[#allocation21_spill]] %s4992_s27  ;;  %s80_s8 = ssub.s32 %s4425_s13, %s4992_s27 }
  0x32   : > { %4040 = dma.hbm_to_vmem [thread:$0]  (!%p4554_p11), %s4969_s1, 1024, %s300_s24, [#allocation9], %s4950_s19, %s4950_s19, %s4952_s23  }
  0x33   : > { %s347_s25 = sshll.u32 %s340_s20, 4  ;;  %p4597_p6 = scmp.eq.s32.totalorder %s80_s8, 0  ;;  %s348_s25 = int_to_ptr.vmem [resolvable:$true] %s347_s25 }
  0x34   : > { %s4601_s19 = scalar_lea.sflag [#allocation6], %s336_s26  ;;  %p4259_p7 = pneg %p4558_p12 }
  0x35   : > { %s346_s9 = scalar_lea.hbm %s4971_s2, %s3225_s30  ;;  %s4270_s28 = scalar_lea.vmem %s348_s25, 1024 }
  0x36   : > { %p4271_p9 = scmp.ne.s32.totalorder %s348_s25, %s4270_s28  ;;  %s4437_s0 = smov [#allocation10]  }
  0x37   : > { %s4275_s16 = sshll.u32 %s4437_s0, 4  ;;  %s4276_s16 = int_to_ptr.vmem [resolvable:$false] %s4275_s16 }
  0x38   : > { %p4273_p4 = pnand %p4271_p9, %p4259_p7  ;;  %s4277_s23 = scalar_lea.vmem %s4276_s16, 2048 }
  0x39   : > { %p4278_p0 = scmp.lt.s32.totalorder %s348_s25, %s4276_s16  ;;  %p4279_p1 = scmp.lt.s32.totalorder %s4277_s23, %s4270_s28 }
  0x3a   : > { %p4274_p10 = pneg %p4273_p4 }
  0x3b   : > { %p4280_p5 = por %p4279_p1, %p4278_p0 }
  0x3d   : > { %p4281_p2 = pnand %p4280_p5, %p4274_p10 }
  0x3f   : > { %4284 = shalt.err (!%p4281_p2)
}
  0x40   : > { %s4973_s8 = smov 4   ;;  %s4974_s26 = smov 64  }
  0x41   : > { %4047 = dma.hbm_to_vmem [thread:$0]  (!%p4558_p12), %s346_s9, 1024, %s348_s25, %s4601_s19, %s4974_s26, %s4974_s26, %s4973_s8  }
  0x42   : > { %s4975_s20 = sadd.s32 1, %s4417_s11  ;;  %s4438_s23 = smov [#allocation12]  }
  0x43   : > { %s4619_s0 = scalar_select %p4597_p6, %s4417_s11, %s4975_s20  }
  0x44   : > { %s319_s28 = sshll.u32 %s4438_s23, 4  ;;  %s4624_s2 = scalar_lea.hbm %s4942_s4, %s3225_s30  ;;  %s320_s28 = int_to_ptr.vmem [resolvable:$true] %s319_s28 }
  0x45   : > { %s367_s27 = scalar_lea.vmem [#allocation11], %s4586_s29  ;;  %s4296_s14 = scalar_lea.vmem %s320_s28, 1024 }
  0x46   : > { %s374_s13 = sshll.u32 %s367_s27, 4  ;;  %p4297_p3 = scmp.ne.s32.totalorder %s320_s28, %s4296_s14  ;;  %s375_s13 = int_to_ptr.vmem [resolvable:$true] %s374_s13 }
  0x47   : > { %p4304_p10 = scmp.lt.s32.totalorder %s320_s28, %s320_s28  ;;  %p4305_p0 = scmp.lt.s32.totalorder %s4296_s14, %s4296_s14 }
  0x48   : > { %p4299_p9 = pnand %p4297_p3, %p4207_p13 }
  0x49   : > { %p4306_p6 = por %p4305_p0, %p4304_p10 }
  0x4a   : > { %p4300_p4 = pneg %p4299_p9 }
  0x4c   : > { %p4307_p1 = pnand %p4306_p6, %p4300_p4 }
  0x4e   : > { %4310 = shalt.err (!%p4307_p1)
}
  0x4f   : > { %4043 = dma.hbm_to_vmem [thread:$0]  (!%p4554_p11), %s4945_s7, 1024, %s320_s28, [#allocation9], %s4974_s26, %s4974_s26, %s4973_s8  }
  0x50   : > { %s4324_s27 = scalar_lea.vmem %s375_s13, 1024  ;;  %s4439_s14 = smov [#allocation11]  }
  0x51   : > { %p4325_p5 = scmp.ne.s32.totalorder %s375_s13, %s4324_s27  ;;  %s4329_s29 = sshll.u32 %s4439_s14, 4  ;;  %s4330_s29 = int_to_ptr.vmem [resolvable:$false] %s4329_s29 }
  0x52   : > { %s4331_s30 = scalar_lea.vmem %s4330_s29, 2048  ;;  %p4332_p3 = scmp.lt.s32.totalorder %s375_s13, %s4330_s29 }
  0x53   : > { %p4327_p13 = pnand %p4325_p5, %p4259_p7  ;;  %p4333_p9 = scmp.lt.s32.totalorder %s4331_s30, %s4324_s27 }
  0x55   : > { %p4328_p2 = pneg %p4327_p13  ;;  %p4334_p4 = por %p4333_p9, %p4332_p3 }
  0x57   : > { %p4335_p10 = pnand %p4334_p4, %p4328_p2 }
  0x59   : > { %4338 = shalt.err (!%p4335_p10)
}
  0x5a   : > { %4050 = dma.hbm_to_vmem [thread:$0]  (!%p4558_p12), %s4624_s2, 1024, %s375_s13, %s4601_s19, %s4974_s26, %s4974_s26, %s4973_s8  }
  0x5b   : > { %392 = sbr.rel (%p4545_p8) target bundleno = 3117 (0xc2d), region = 56  ;;  %p4976_p11 = scmp.eq.s32.totalorder (!%p4545_p8), %s4529_s15, 0 }
  0x60   : > { %4388 = dma.done.wait (%p4976_p11), [#allocation6], 512   ;;  %p4977_p7 = pmov %p4976_p11 }
  0x62   : > { %4390 = vsyncadd (%p4977_p7), [#allocation6], 4294966784  ;;  %p4978_p0 = pmov %p4977_p7 }
  0x64   : > { %4392 = dma.done.wait (%p4978_p0), [#allocation9], 1024   ;;  %p4979_p6 = pmov %p4978_p0 }
  0x65   : > { %s402_s21 = sand.u32 1, %s4529_s15   ;;  %s404_s2 = sand.u32 1, %s4413_s10  }
  0x66   : > { %4394 = vsyncadd (%p4979_p6), [#allocation9], 4294966272  ;;  %s3073_s13 = sshll.u32 %s404_s2, 6  ;;  %s403_s18 = scalar_lea.sflag [#allocation6], %s402_s21 }
  0x67   : > { %s4660_s22 = scalar_lea.vmem [#allocation10], %s3073_s13  ;;  %p4980_p8 = scmp.ne.s32.totalorder %s4964_s17, 0 }
  0x69   : > { %4396 = dma.done.wait (%p4980_p8), %s403_s18, 2048  }
  0x6a   : > { %4398 = vsyncadd (%p4980_p8), %s403_s18, 4294965248  ;;  %s4666_s19 = scalar_lea.vmem [#allocation11], %s3073_s13  ;;  %p4981_p12 = pmov %p4978_p0 }
  0x6b   : > { %p4982_p1 = pmov %p4978_p0 }
  0x6c   : > { %4400 = dma.done.wait (%p4981_p12), [#allocation9], 1024  }
  0x6d   : > { %4402 = vsyncadd (%p4982_p1), [#allocation9], 4294966272  ;;  %p464_p5 = scmp.lt.s32.totalorder %s4421_s12, 1  ;;  %p476_p13 = scmp.eq.s32.totalorder %s4421_s12, 0 }
  0x6e   : > { %v4440_v0 = vmov (%p476_p13), 0.0  }
  0x6f   : > { %s465_s25 = scalar_select %p464_p5, %s4421_s12, 1  ;;  %482 = vst [vmem:[#allocation4] sm:$0xff] (%p476_p13), %v4440_v0 }
  0x70   : > { %481 = sbr.rel (!%p476_p13) target bundleno = 117 (0x75), region = 80 }
  0x71   : > { %s4678_s26 = scalar_lea.vmem %s4941_s3, %s465_s25  ;;  %s4683_s23 = scalar_lea.vmem %s4943_s5, %s465_s25 }
  0x75 PF: > { %p3077_p2 = scmp.ne.s32.totalorder %s4421_s12, 0 }
  0x76   : > { %p3120_p3 = scmp.ne.s32.totalorder (!%p3077_p2), %s4421_s12, 1 }
  0x77   : > { %485 = sbr.rel (%p3077_p2) target bundleno = 1029 (0x405), region = 84 }
  0x7c   : > { %v4125_v1 = vld [vmem:[#allocation8 + $0x38] sm:$0xff]   ;;  %v4126_v2 = vld [vmem:[#allocation8 + $0x30] sm:$0xff]   ;;  %v4127_v3 = vld [vmem:[#allocation8 + $0x28] sm:$0xff]  }
  0x7d   : > { %3598 = vmatprep.subr.bf16.mxu0 %v4125_v1  ;;  %v4128_v4 = vld [vmem:[#allocation8 + $0x20] sm:$0xff]   ;;  %v4133_v7 = vld [vmem:[%s4660_s22 + $0x38] sm:$0xff]   ;;  %v4134_v8 = vld [vmem:[%s4660_s22 + $0x30] sm:$0xff]  }
  0x7e   : > { %3599 = vmatpush3.bf16.msra.mxu0 %v4125_v1  ;;  %v490_v5 = vld [vmem:[#allocation5] sm:$0xff]  ;;  %v4129_v9 = vld [vmem:[#allocation8 + $0x18] sm:$0xff]   ;;  %3630 = vmatprep.subr.bf16.mxu1 %v4133_v7  ;;  %v4135_v10 = vld [vmem:[%s4660_s22 + $0x28] sm:$0xff]  }
  0x7f   : > { %3600 = vmatprep.subr.bf16.mxu0 %v4126_v2  ;;  %v494_v6 = vunpack.c.l.s8.bf16 %v490_v5  ;;  %3631 = vmatpush3.bf16.msra.mxu1 %v4133_v7  ;;  %v4130_v11 = vld [vmem:[#allocation8 + $0x10] sm:$0xff]   ;;  %v4136_v12 = vld [vmem:[%s4660_s22 + $0x20] sm:$0xff]   ;;  %v4131_v13 = vld [vmem:[#allocation8 + $0x8] sm:$0xff]   ;;  %v495_v18 = vunpack.c.h.s8.bf16 %v490_v5 }
  0x80   : > { %3632 = vmatprep.subr.bf16.mxu1 %v4134_v8  ;;  %v4137_v14 = vld [vmem:[%s4660_s22 + $0x18] sm:$0xff]   ;;  %v4132_v15 = vld [vmem:[#allocation8] sm:$0xff]   ;;  %v4138_v16 = vld [vmem:[%s4660_s22 + $0x10] sm:$0xff]  }
  0x81   : > { %3614 = vmatprep.mubr.bf16.mxu0 %v494_v6  ;;  %v491_v17 = vld [vmem:[#allocation5 + $0x8] sm:$0xff]  ;;  %v492_v20 = vld [vmem:[#allocation5 + $0x10] sm:$0xff]  ;;  %v493_v23 = vld [vmem:[#allocation5 + $0x18] sm:$0xff] }
  0x82   : > { %3601 = vmatpush3.bf16.msra.mxu0 %v4126_v2  ;;  %v496_v19 = vunpack.c.l.s8.bf16 %v491_v17  ;;  %v497_v21 = vunpack.c.h.s8.bf16 %v491_v17  ;;  %v498_v22 = vunpack.c.l.s8.bf16 %v492_v20  ;;  %v499_v24 = vunpack.c.h.s8.bf16 %v492_v20  ;;  %v4139_v27 = vld [vmem:[%s4660_s22 + $0x8] sm:$0xff]   ;;  %v4140_v28 = vld [vmem:[%s4660_s22] sm:$0xff]   ;;  %v4141_v29 = vld [vmem:[%s4666_s19 + $0x38] sm:$0xff]  }
  0x83   : > { %3602 = vmatprep.subr.bf16.mxu0 %v4127_v3  ;;  %3633 = vmatpush3.bf16.msra.mxu1 %v4134_v8  ;;  %v500_v25 = vunpack.c.l.s8.bf16 %v493_v23  ;;  %v501_v26 = vunpack.c.h.s8.bf16 %v493_v23  ;;  %v4142_v30 = vld [vmem:[%s4666_s19 + $0x30] sm:$0xff]   ;;  %v4143_v31 = vld [vmem:[%s4666_s19 + $0x28] sm:$0xff]   ;;  %v4144_v32 = vld [vmem:[%s4666_s19 + $0x20] sm:$0xff]  }
  0x84   : > { %3634 = vmatprep.subr.bf16.mxu1 %v4135_v10  ;;  %v4145_v33 = vld [vmem:[%s4666_s19 + $0x18] sm:$0xff]   ;;  %v4146_v58 = vld [vmem:[%s4666_s19 + $0x10] sm:$0xff]   ;;  %v4147_v59 = vld [vmem:[%s4666_s19 + $0x8] sm:$0xff]  }
  0x85   : > { %v4148_v60 = vld [vmem:[%s4666_s19] sm:$0xff]   ;;  %v4703_v62 = vld [vmem:[%s4678_s26] ss:$0 sm:$0xff] }
  0x86   : > { %3603 = vmatpush3.bf16.msra.mxu0 %v4127_v3 }
  0x87   : > { %3604 = vmatprep.subr.bf16.mxu0 %v4128_v4  ;;  %3635 = vmatpush3.bf16.msra.mxu1 %v4135_v10 }
  0x88   : > { %3636 = vmatprep.subr.bf16.mxu1 %v4136_v12 }
  0x8a   : > { %3605 = vmatpush3.bf16.msra.mxu0 %v4128_v4 }
  0x8b   : > { %3606 = vmatprep.subr.bf16.mxu0 %v4129_v9  ;;  %3637 = vmatpush3.bf16.msra.mxu1 %v4136_v12 }
  0x8c   : > { %3638 = vmatprep.subr.bf16.mxu1 %v4137_v14 }
  0x8e   : > { %3607 = vmatpush3.bf16.msra.mxu0 %v4129_v9 }
  0x8f   : > { %3608 = vmatprep.subr.bf16.mxu0 %v4130_v11  ;;  %3639 = vmatpush3.bf16.msra.mxu1 %v4137_v14 }
  0x90   : > { %3640 = vmatprep.subr.bf16.mxu1 %v4138_v16 }
  0x92   : > { %3609 = vmatpush3.bf16.msra.mxu0 %v4130_v11 }
  0x93   : > { %3610 = vmatprep.subr.bf16.mxu0 %v4131_v13  ;;  %3641 = vmatpush3.bf16.msra.mxu1 %v4138_v16 }
  0x94   : > { %3642 = vmatprep.subr.bf16.mxu1 %v4139_v27 }
  0x96   : > { %3611 = vmatpush3.bf16.msra.mxu0 %v4131_v13 }
  0x97   : > { %3612 = vmatprep.subr.bf16.mxu0 %v4132_v15  ;;  %3643 = vmatpush3.bf16.msra.mxu1 %v4139_v27 }
  0x98   : > { %3644 = vmatprep.subr.bf16.mxu1 %v4140_v28 }
  0x9a   : > { %3613 = vmatpush3.bf16.msra.mxu0 %v4132_v15 }
  0x9b   : > { %3645 = vmatpush3.bf16.msra.mxu1 %v4140_v28  ;;  %3662 = vmatprep.subr.bf16.mxu0 %v4141_v29 }
  0x9c   : > { %3966 = vmatprep.subr.bf16.mxu1 %v4141_v29 }
  0x9d   : > { %3615 = vmatmul.mubr.bf16.vlgmr.msra.gmra.mxu0 %v495_v18 }
  0x9e   : > { %3618 = vmatprep.mubr.bf16.mxu0 %v496_v19  ;;  %3663 = vmatpush3.bf16.msra.mxu0 %v4141_v29 }
  0x9f   : > { %3664 = vmatprep.subr.bf16.mxu0 %v4142_v30 }
  0xa2   : > { %3665 = vmatpush3.bf16.msra.mxu0 %v4142_v30 }
  0xa3   : > { %3666 = vmatprep.subr.bf16.mxu0 %v4143_v31 }
  0xa5   : > { %3619 = vmatmul.mubr.bf16.gmra.mxu0 %v497_v21 }
  0xa6   : > { %3622 = vmatprep.mubr.bf16.mxu0 %v498_v22  ;;  %3667 = vmatpush3.bf16.msra.mxu0 %v4143_v31 }
  0xa7   : > { %3668 = vmatprep.subr.bf16.mxu0 %v4144_v32 }
  0xaa   : > { %3669 = vmatpush3.bf16.msra.mxu0 %v4144_v32 }
  0xab   : > { %3670 = vmatprep.subr.bf16.mxu0 %v4145_v33 }
  0xad   : > { %3623 = vmatmul.mubr.bf16.gmra.mxu0 %v499_v24 }
  0xae   : > { %3626 = vmatprep.mubr.bf16.mxu0 %v500_v25  ;;  %3671 = vmatpush3.bf16.msra.mxu0 %v4145_v33 }
  0xaf   : > { %3672 = vmatprep.subr.bf16.mxu0 %v4146_v58 }
  0xb2   : > { %3673 = vmatpush3.bf16.msra.mxu0 %v4146_v58 }
  0xb3   : > { %3674 = vmatprep.subr.bf16.mxu0 %v4147_v59 }
  0xb5   : > { %3627 = vmatmul.mubr.bf16.gmra.mxu0 %v501_v26 }
  0xb6   : > { %3675 = vmatpush3.bf16.msra.mxu0 %v4147_v59 }
  0xb7   : > { %3676 = vmatprep.subr.bf16.mxu0 %v4148_v60 }
  0xba   : > { %3677 = vmatpush3.bf16.msra.mxu0 %v4148_v60 }
 0x15d   : > { %v3616_v34 = vpop.f32.mrf.mxu0 }
 0x15f   : > { %v600_v35 = vpop.f32.mrf.mxu0 }
 0x161   : > { %v3617_v36 = vpop.f32.mrf.mxu0 }
 0x162   : > { %v664_v39 = vpack.c.bf16 %v3617_v36, %v3616_v34 }
 0x163   : > { %v603_v37 = vpop.f32.mrf.mxu0 }
 0x164   : > { %v663_v38 = vpack.c.bf16 %v603_v37, %v600_v35 }
 0x165   : > { %v3620_v40 = vpop.f32.mrf.mxu0 }
 0x166   : > { %3646 = vmatprep.mubr.bf16.mxu1 %v663_v38 }
 0x167   : > { %v616_v41 = vpop.f32.mrf.mxu0  ;;  %3647 = vmatmul.mubr.bf16.vlgmr.msra.gmra.mxu1 %v664_v39 }
 0x168   : > { %3974 = vmatpush3.bf16.msra.mxu1 %v4141_v29 }
 0x169   : > { %v3621_v42 = vpop.f32.mrf.mxu0  ;;  %3967 = vmatprep.subr.bf16.mxu1 %v4142_v30 }
 0x16a   : > { %v666_v45 = vpack.c.bf16 %v3621_v42, %v3620_v40 }
 0x16b   : > { %v619_v43 = vpop.f32.mrf.mxu0 }
 0x16c   : > { %v665_v44 = vpack.c.bf16 %v619_v43, %v616_v41  ;;  %3975 = vmatpush3.bf16.msra.mxu1 %v4142_v30 }
 0x16d   : > { %v3624_v46 = vpop.f32.mrf.mxu0  ;;  %3968 = vmatprep.subr.bf16.mxu1 %v4143_v31 }
 0x16e   : > { %3650 = vmatprep.mubr.bf16.mxu1 %v665_v44 }
 0x16f   : > { %v632_v47 = vpop.f32.mrf.mxu0  ;;  %3651 = vmatmul.mubr.bf16.gmra.mxu1 %v666_v45 }
 0x170   : > { %3976 = vmatpush3.bf16.msra.mxu1 %v4143_v31 }
 0x171   : > { %v3625_v48 = vpop.f32.mrf.mxu0  ;;  %3969 = vmatprep.subr.bf16.mxu1 %v4144_v32 }
 0x172   : > { %v668_v51 = vpack.c.bf16 %v3625_v48, %v3624_v46 }
 0x173   : > { %v635_v49 = vpop.f32.mrf.mxu0 }
 0x174   : > { %v667_v50 = vpack.c.bf16 %v635_v49, %v632_v47  ;;  %3977 = vmatpush3.bf16.msra.mxu1 %v4144_v32 }
 0x175   : > { %v3628_v52 = vpop.f32.mrf.mxu0  ;;  %3970 = vmatprep.subr.bf16.mxu1 %v4145_v33 }
 0x176   : > { %3654 = vmatprep.mubr.bf16.mxu1 %v667_v50 }
 0x177   : > { %v648_v53 = vpop.f32.mrf.mxu0  ;;  %3655 = vmatmul.mubr.bf16.gmra.mxu1 %v668_v51 }
 0x178   : > { %3978 = vmatpush3.bf16.msra.mxu1 %v4145_v33 }
 0x179   : > { %v3629_v54 = vpop.f32.mrf.mxu0  ;;  %3971 = vmatprep.subr.bf16.mxu1 %v4146_v58 }
 0x17a   : > { %v670_v57 = vpack.c.bf16 %v3629_v54, %v3628_v52 }
 0x17b   : > { %v651_v55 = vpop.f32.mrf.mxu0 }
 0x17c   : > { %v669_v56 = vpack.c.bf16 %v651_v55, %v648_v53  ;;  %3979 = vmatpush3.bf16.msra.mxu1 %v4146_v58 }
 0x17d   : > { %3972 = vmatprep.subr.bf16.mxu1 %v4147_v59 }
 0x17e   : > { %3658 = vmatprep.mubr.bf16.mxu1 %v669_v56 }
 0x17f   : > { %3659 = vmatmul.mubr.bf16.gmra.mxu1 %v670_v57 }
 0x180   : > { %3980 = vmatpush3.bf16.msra.mxu1 %v4147_v59 }
 0x181   : > { %3973 = vmatprep.subr.bf16.mxu1 %v4148_v60 }
 0x184   : > { %3981 = vmatpush3.bf16.msra.mxu1 %v4148_v60 }
 0x227   : > { %v3648_v61 = vpop.f32.mrf.mxu1 }
 0x228   : > { %v785_v1 = vadd.f32 %v3648_v61, %v4703_v62 }
 0x229   : > { %v776_v63 = vpop.f32.mrf.mxu1 }
 0x22a   : > { %v777_v0 = vadd.f32 %v4703_v62, %v776_v63  ;;  %v857_v8 = vmul.f32 0.2, %v785_v1  ;;  %vm841_vm2 = vcmp.gt.f32.partialorder %v785_v1, 0.0 }
 0x22b   : > { %v3649_v2 = vpop.f32.mrf.mxu1 }
 0x22c   : > { %v788_v3 = vadd.f32 %v3649_v2, %v4703_v62  ;;  %v855_v5 = vmul.f32 0.2, %v777_v0  ;;  %vm839_vm1 = vcmp.gt.f32.partialorder %v777_v0, 0.0  ;;  %v873_v16 = vsel %vm841_vm2, %v785_v1, %v857_v8 }
 0x22d   : > { %v779_v4 = vpop.f32.mrf.mxu1 }
 0x22e   : > { %vm842_vm0 = vcmp.gt.f32.partialorder %v788_v3, 0.0  ;;  %v858_v6 = vmul.f32 0.2, %v788_v3  ;;  %v780_v7 = vadd.f32 %v4703_v62, %v779_v4  ;;  %v871_v14 = vsel %vm839_vm1, %v777_v0, %v855_v5 }
 0x22f   : > { %v3652_v9 = vpop.f32.mrf.mxu1 }
 0x230   : > { %vm840_vm3 = vcmp.gt.f32.partialorder %v780_v7, 0.0  ;;  %v856_v10 = vmul.f32 0.2, %v780_v7  ;;  %v874_v11 = vsel %vm842_vm0, %v788_v3, %v858_v6  ;;  %v801_v17 = vadd.f32 %v3652_v9, %v4703_v62 }
 0x231   : > { %v792_v12 = vpop.f32.mrf.mxu1  ;;  %v888_v20 = vpack.c.bf16 %v874_v11, %v873_v16 }
 0x232   : > { %v793_v13 = vadd.f32 %v4703_v62, %v792_v12  ;;  %v872_v15 = vsel %vm840_vm3, %v780_v7, %v856_v10  ;;  %v861_v26 = vmul.f32 0.2, %v801_v17  ;;  %vm845_vm6 = vcmp.gt.f32.partialorder %v801_v17, 0.0  ;;  %v4722_v7 = vld [vmem:[%s4683_s23] ss:$0 sm:$0xff] }
 0x233   : > { %v3653_v18 = vpop.f32.mrf.mxu1  ;;  %v887_v19 = vpack.c.bf16 %v872_v15, %v871_v14 }
 0x234   : > { %v804_v21 = vadd.f32 %v3653_v18, %v4703_v62  ;;  %v859_v23 = vmul.f32 0.2, %v793_v13  ;;  %vm843_vm5 = vcmp.gt.f32.partialorder %v793_v13, 0.0  ;;  %v877_v37 = vsel %vm845_vm6, %v801_v17, %v861_v26 }
 0x235   : > { %v795_v22 = vpop.f32.mrf.mxu1  ;;  %3678 = vmatprep.mubr.bf16.mxu0 %v887_v19 }
 0x236   : > { %vm846_vm4 = vcmp.gt.f32.partialorder %v804_v21, 0.0  ;;  %v862_v24 = vmul.f32 0.2, %v804_v21  ;;  %v796_v25 = vadd.f32 %v4703_v62, %v795_v22  ;;  %3679 = vmatmul.mubr.bf16.vlgmr.msra.gmra.mxu0 %v888_v20  ;;  %v875_v32 = vsel %vm843_vm5, %v793_v13, %v859_v23 }
 0x237   : > { %v3656_v27 = vpop.f32.mrf.mxu1 }
 0x238   : > { %vm844_vm7 = vcmp.gt.f32.partialorder %v796_v25, 0.0  ;;  %v860_v28 = vmul.f32 0.2, %v796_v25  ;;  %v878_v30 = vsel %vm846_vm4, %v804_v21, %v862_v24  ;;  %v817_v34 = vadd.f32 %v3656_v27, %v4703_v62 }
 0x239   : > { %v808_v29 = vpop.f32.mrf.mxu1  ;;  %v890_v39 = vpack.c.bf16 %v878_v30, %v877_v37 }
 0x23a   : > { %v809_v31 = vadd.f32 %v4703_v62, %v808_v29  ;;  %v876_v33 = vsel %vm844_vm7, %v796_v25, %v860_v28  ;;  %v865_v44 = vmul.f32 0.2, %v817_v34  ;;  %vm849_vm10 = vcmp.gt.f32.partialorder %v817_v34, 0.0 }
 0x23b   : > { %v3657_v35 = vpop.f32.mrf.mxu1  ;;  %v889_v36 = vpack.c.bf16 %v876_v33, %v875_v32 }
 0x23c   : > { %v820_v38 = vadd.f32 %v3657_v35, %v4703_v62  ;;  %v863_v41 = vmul.f32 0.2, %v809_v31  ;;  %vm847_vm9 = vcmp.gt.f32.partialorder %v809_v31, 0.0  ;;  %v881_v52 = vsel %vm849_vm10, %v817_v34, %v865_v44 }
 0x23d   : > { %v811_v40 = vpop.f32.mrf.mxu1  ;;  %3682 = vmatprep.mubr.bf16.mxu0 %v889_v36 }
 0x23e   : > { %vm850_vm8 = vcmp.gt.f32.partialorder %v820_v38, 0.0  ;;  %v866_v42 = vmul.f32 0.2, %v820_v38  ;;  %v812_v43 = vadd.f32 %v4703_v62, %v811_v40  ;;  %3683 = vmatmul.mubr.bf16.gmra.mxu0 %v890_v39  ;;  %v879_v50 = vsel %vm847_vm9, %v809_v31, %v863_v41 }
 0x23f   : > { %v3660_v45 = vpop.f32.mrf.mxu1 }
 0x240   : > { %vm848_vm11 = vcmp.gt.f32.partialorder %v812_v43, 0.0  ;;  %v864_v46 = vmul.f32 0.2, %v812_v43  ;;  %v882_v47 = vsel %vm850_vm8, %v820_v38, %v866_v42  ;;  %v833_v53 = vadd.f32 %v3660_v45, %v4703_v62 }
 0x241   : > { %v824_v48 = vpop.f32.mrf.mxu1  ;;  %v892_v56 = vpack.c.bf16 %v882_v47, %v881_v52 }
 0x242   : > { %v825_v49 = vadd.f32 %v4703_v62, %v824_v48  ;;  %v880_v51 = vsel %vm848_vm11, %v812_v43, %v864_v46  ;;  %v869_v63 = vmul.f32 0.2, %v833_v53  ;;  %vm853_vm14 = vcmp.gt.f32.partialorder %v833_v53, 0.0 }
 0x243   : > { %v3661_v54 = vpop.f32.mrf.mxu1  ;;  %v891_v55 = vpack.c.bf16 %v880_v51, %v879_v50 }
 0x244   : > { %v836_v57 = vadd.f32 %v3661_v54, %v4703_v62  ;;  %v867_v59 = vmul.f32 0.2, %v825_v49  ;;  %vm851_vm13 = vcmp.gt.f32.partialorder %v825_v49, 0.0  ;;  %v885_v5 = vsel %vm853_vm14, %v833_v53, %v869_v63 }
 0x245   : > { %v827_v58 = vpop.f32.mrf.mxu1  ;;  %3686 = vmatprep.mubr.bf16.mxu1 %v891_v55 }
 0x246   : > { %vm854_vm12 = vcmp.gt.f32.partialorder %v836_v57, 0.0  ;;  %v870_v60 = vmul.f32 0.2, %v836_v57  ;;  %v828_v61 = vadd.f32 %v4703_v62, %v827_v58  ;;  %3687 = vmatmul.mubr.bf16.vlgmr.msra.gmra.mxu1 %v892_v56  ;;  %v883_v2 = vsel %vm851_vm13, %v825_v49, %v867_v59 }
 0x248   : > { %vm852_vm15 = vcmp.gt.f32.partialorder %v828_v61, 0.0  ;;  %v868_v0 = vmul.f32 0.2, %v828_v61  ;;  %v886_v1 = vsel %vm854_vm12, %v836_v57, %v870_v60 }
 0x249   : > { %v894_v6 = vpack.c.bf16 %v886_v1, %v885_v5 }
 0x24a   : > { %v884_v3 = vsel %vm852_vm15, %v828_v61, %v868_v0 }
 0x24b   : > { %v893_v4 = vpack.c.bf16 %v884_v3, %v883_v2 }
 0x24d   : > { %3690 = vmatprep.mubr.bf16.mxu1 %v893_v4 }
 0x24e   : > { %3691 = vmatmul.mubr.bf16.gmra.mxu1 %v894_v6 }
 0x2f6   : > { %v3680_v8 = vpop.f32.mrf.mxu0 }
 0x2f7   : > { %v1009_v9 = vadd.f32 %v3680_v8, %v4722_v7 }
 0x2f8   : > { %v1000_v62 = vpop.f32.mrf.mxu0 }
 0x2f9   : > { %v1001_v10 = vadd.f32 %v4722_v7, %v1000_v62  ;;  %v1081_v11 = vmul.f32 0.2, %v1009_v9  ;;  %vm1065_vm0 = vcmp.gt.f32.partialorder %v1009_v9, 0.0 }
 0x2fa   : > { %v3681_v12 = vpop.f32.mrf.mxu0 }
 0x2fb   : > { %v1012_v13 = vadd.f32 %v3681_v12, %v4722_v7  ;;  %v1079_v15 = vmul.f32 0.2, %v1001_v10  ;;  %v1097_v18 = vsel %vm1065_vm0, %v1009_v9, %v1081_v11  ;;  %vm1063_vm2 = vcmp.gt.f32.partialorder %v1001_v10, 0.0 }
 0x2fc   : > { %v1003_v14 = vpop.f32.mrf.mxu0 }
 0x2fd   : > { %vm1066_vm1 = vcmp.gt.f32.partialorder %v1012_v13, 0.0  ;;  %v1082_v16 = vmul.f32 0.2, %v1012_v13  ;;  %v1004_v17 = vadd.f32 %v4722_v7, %v1003_v14  ;;  %v1095_v25 = vsel %vm1063_vm2, %v1001_v10, %v1079_v15 }
 0x2fe   : > { %v3684_v19 = vpop.f32.mrf.mxu0 }
 0x2ff   : > { %v1098_v20 = vsel %vm1066_vm1, %v1012_v13, %v1082_v16  ;;  %vm1064_vm3 = vcmp.gt.f32.partialorder %v1004_v17, 0.0  ;;  %v1080_v21 = vmul.f32 0.2, %v1004_v17  ;;  %v1025_v22 = vadd.f32 %v3684_v19, %v4722_v7 }
 0x300   : > { %v4729_v23 = vpack.c.bf16 %v1098_v20, %v1097_v18  ;;  %v1016_v24 = vpop.f32.mrf.mxu0 }
 0x301   : > { %v1096_v26 = vsel %vm1064_vm3, %v1004_v17, %v1080_v21  ;;  %v1017_v27 = vadd.f32 %v4722_v7, %v1016_v24  ;;  %v1085_v29 = vmul.f32 0.2, %v1025_v22  ;;  %vm1069_vm4 = vcmp.gt.f32.partialorder %v1025_v22, 0.0 }
 0x302   : > { %3397 = vst [vmem:[#allocation3 + $0x8] sm:$0xff] %v4729_v23   ;;  %v4733_v28 = vpack.c.bf16 %v1096_v26, %v1095_v25  ;;  %v3685_v30 = vpop.f32.mrf.mxu0 }
 0x303   : > { %v1028_v31 = vadd.f32 %v3685_v30, %v4722_v7  ;;  %v1083_v33 = vmul.f32 0.2, %v1017_v27  ;;  %v1101_v36 = vsel %vm1069_vm4, %v1025_v22, %v1085_v29  ;;  %vm1067_vm6 = vcmp.gt.f32.partialorder %v1017_v27, 0.0 }
 0x304   : > { %3281 = vst [vmem:[#allocation3] sm:$0xff] %v4733_v28   ;;  %v1019_v32 = vpop.f32.mrf.mxu0 }
 0x305   : > { %vm1070_vm5 = vcmp.gt.f32.partialorder %v1028_v31, 0.0  ;;  %v1086_v34 = vmul.f32 0.2, %v1028_v31  ;;  %v1020_v35 = vadd.f32 %v4722_v7, %v1019_v32  ;;  %v1099_v43 = vsel %vm1067_vm6, %v1017_v27, %v1083_v33 }
 0x306   : > { %v3688_v37 = vpop.f32.mrf.mxu1 }
 0x307   : > { %v1102_v38 = vsel %vm1070_vm5, %v1028_v31, %v1086_v34  ;;  %vm1068_vm7 = vcmp.gt.f32.partialorder %v1020_v35, 0.0  ;;  %v1084_v39 = vmul.f32 0.2, %v1020_v35  ;;  %v1041_v40 = vadd.f32 %v3688_v37, %v4722_v7 }
 0x308   : > { %v4739_v41 = vpack.c.bf16 %v1102_v38, %v1101_v36  ;;  %v1032_v42 = vpop.f32.mrf.mxu1 }
 0x309   : > { %v1100_v44 = vsel %vm1068_vm7, %v1020_v35, %v1084_v39  ;;  %v1033_v45 = vadd.f32 %v4722_v7, %v1032_v42  ;;  %v1089_v47 = vmul.f32 0.2, %v1041_v40  ;;  %vm1073_vm8 = vcmp.gt.f32.partialorder %v1041_v40, 0.0 }
 0x30a   : > { %3399 = vst [vmem:[#allocation3 + $0x18] sm:$0xff] %v4739_v41   ;;  %v1113_v46 = vpack.c.bf16 %v1100_v44, %v1099_v43  ;;  %v3689_v48 = vpop.f32.mrf.mxu1 }
 0x30b   : > { %v1044_v49 = vadd.f32 %v3689_v48, %v4722_v7  ;;  %v1087_v51 = vmul.f32 0.2, %v1033_v45  ;;  %v1105_v54 = vsel %vm1073_vm8, %v1041_v40, %v1089_v47  ;;  %vm1071_vm10 = vcmp.gt.f32.partialorder %v1033_v45, 0.0 }
 0x30c   : > { %3398 = vst [vmem:[#allocation3 + $0x10] sm:$0xff] %v1113_v46   ;;  %v1035_v50 = vpop.f32.mrf.mxu1 }
 0x30d   : > { %vm1074_vm9 = vcmp.gt.f32.partialorder %v1044_v49, 0.0  ;;  %v1090_v52 = vmul.f32 0.2, %v1044_v49  ;;  %v1036_v53 = vadd.f32 %v4722_v7, %v1035_v50  ;;  %v1103_v61 = vsel %vm1071_vm10, %v1033_v45, %v1087_v51 }
 0x30e   : > { %v3692_v55 = vpop.f32.mrf.mxu1 }
 0x30f   : > { %v1106_v56 = vsel %vm1074_vm9, %v1044_v49, %v1090_v52  ;;  %vm1072_vm11 = vcmp.gt.f32.partialorder %v1036_v53, 0.0  ;;  %v1088_v57 = vmul.f32 0.2, %v1036_v53  ;;  %v1057_v58 = vadd.f32 %v3692_v55, %v4722_v7 }
 0x310   : > { %v1116_v59 = vpack.c.bf16 %v1106_v56, %v1105_v54  ;;  %v1048_v60 = vpop.f32.mrf.mxu1 }
 0x311   : > { %v1104_v63 = vsel %vm1072_vm11, %v1036_v53, %v1088_v57  ;;  %v1049_v0 = vadd.f32 %v4722_v7, %v1048_v60  ;;  %v1093_v3 = vmul.f32 0.2, %v1057_v58  ;;  %vm1077_vm12 = vcmp.gt.f32.partialorder %v1057_v58, 0.0 }
 0x312   : > { %3401 = vst [vmem:[#allocation3 + $0x28] sm:$0xff] %v1116_v59   ;;  %v1115_v1 = vpack.c.bf16 %v1104_v63, %v1103_v61  ;;  %v3693_v2 = vpop.f32.mrf.mxu1 }
 0x313   : > { %v1060_v4 = vadd.f32 %v3693_v2, %v4722_v7  ;;  %v1091_v6 = vmul.f32 0.2, %v1049_v0  ;;  %vm1075_vm14 = vcmp.gt.f32.partialorder %v1049_v0, 0.0  ;;  %v1109_v62 = vsel %vm1077_vm12, %v1057_v58, %v1093_v3 }
 0x314   : > { %3400 = vst [vmem:[#allocation3 + $0x20] sm:$0xff] %v1115_v1   ;;  %v1051_v5 = vpop.f32.mrf.mxu1 }
 0x315   : > { %vm1078_vm13 = vcmp.gt.f32.partialorder %v1060_v4, 0.0  ;;  %v1094_v8 = vmul.f32 0.2, %v1060_v4  ;;  %v1052_v9 = vadd.f32 %v4722_v7, %v1051_v5  ;;  %v1107_v13 = vsel %vm1075_vm14, %v1049_v0, %v1091_v6 }
 0x317   : > { %v1110_v10 = vsel %vm1078_vm13, %v1060_v4, %v1094_v8  ;;  %vm1076_vm15 = vcmp.gt.f32.partialorder %v1052_v9, 0.0  ;;  %v1092_v11 = vmul.f32 0.2, %v1052_v9 }
 0x318   : > { %v1118_v12 = vpack.c.bf16 %v1110_v10, %v1109_v62  ;;  %1198 = sbr.rel (%p3120_p3) target bundleno = 1029 (0x405), region = 88 }
 0x319   : > { %v1108_v14 = vsel %vm1076_vm15, %v1052_v9, %v1092_v11 }
 0x31a   : > { %3403 = vst [vmem:[#allocation3 + $0x38] sm:$0xff] %v1118_v12   ;;  %v1117_v15 = vpack.c.bf16 %v1108_v14, %v1107_v13 }
 0x31c   : > { %3402 = vst [vmem:[#allocation3 + $0x30] sm:$0xff] %v1117_v15  }
 0x31d   : > { %v4441_v16 = vmov 0.0   ;;  %vm4442_vm0 = vmmov 0   ;;  %v1200_v7 = vld [vmem:[%s4944_s6] sm:$0xf] }
 0x31e   : > { %3694 = vmatprep.subr.bf16.mxu0 %v4441_v16  ;;  %3710 = vmatprep.mubr.msk.bf16.mxu0 %vm4442_vm0, %v4441_v16  ;;  %v1199_v17 = vld [vmem:[#allocation4] sm:$0xff] }
 0x31f   : > { %3695 = vmatpush3.bf16.msra.mxu0 %v1118_v12 }
 0x320   : > { %3696 = vmatprep.subr.bf16.mxu0 %v4441_v16 }
 0x323   : > { %3697 = vmatpush3.bf16.msra.mxu0 %v1117_v15 }
 0x324   : > { %3698 = vmatprep.subr.bf16.mxu0 %v4441_v16 }
 0x327   : > { %3699 = vmatpush3.bf16.msra.mxu0 %v1116_v59 }
 0x328   : > { %3700 = vmatprep.subr.bf16.mxu0 %v4441_v16 }
 0x32b   : > { %3701 = vmatpush3.bf16.msra.mxu0 %v1115_v1 }
 0x32c   : > { %3702 = vmatprep.subr.bf16.mxu0 %v4441_v16 }
 0x32f   : > { %3703 = vmatpush3.bf16.msra.mxu0 %v4739_v41 }
 0x330   : > { %3704 = vmatprep.subr.bf16.mxu0 %v4441_v16 }
 0x333   : > { %3705 = vmatpush3.bf16.msra.mxu0 %v1113_v46 }
 0x334   : > { %3706 = vmatprep.subr.bf16.mxu0 %v4441_v16 }
 0x337   : > { %3707 = vmatpush3.bf16.msra.mxu0 %v4729_v23 }
 0x338   : > { %3708 = vmatprep.subr.bf16.mxu0 %v4441_v16 }
 0x33b   : > { %3709 = vmatpush3.bf16.msra.mxu0 %v4733_v28 }
 0x33e   : > { %3711 = vmatmul.mubr.bf16.vlgmr.msra.gmra.mxu0 %v1200_v7 }
 0x3fe   : > { %v1235_v18 = vpop.f32.mrf.mxu0 }
 0x3ff   : > { %v1241_v19 = vadd.f32 %v1235_v18, %v1199_v17 }
 0x400   : > { %v3712_v20 = vpop.f32.mrf.mxu0 }
 0x401   : > { %1242 = vst [vmem:[#allocation4] sm:$0xff] %v1241_v19 }
 0x402   : > { %v1238_v21 = vpop.f32.mrf.mxu0 }
 0x404   : > { %v3713_v22 = vpop.f32.mrf.mxu0 }
 0x405 PF: > { %p1243_p9 = scmp.lt.s32.totalorder %s4421_s12, 0  ;;  %s1244_s1 = ssub.s32 0, %s4421_s12 }
 0x406   : > { %s3121_s9 = smin.u32 %s4421_s12, %s1244_s1 }
 0x407   : > { %s1246_s27 = sand.u32 1, %s3121_s9  }
 0x408   : > { %s1247_s14 = ssub.s32 0, %s1246_s27 }
 0x409   : > { %s4994_s14 = smov (!%p1243_p9, %s1247_s14), %s1246_s27 }
 0x40a   : > { %p3123_p4 = scmp.lt.s32.totalorder %s4994_s14, 0  ;;  %s1253_s29 = sadd.s32 2, %s4994_s14 }
 0x40c   : > { %s4996_s29 = smov (!%p3123_p4, %s1253_s29), %s4994_s14 }
 0x40d   : > { %p3124_p10 = scmp.ne.s32.totalorder %s4996_s29, 1 }
 0x40e   : > { %p3167_p11 = scmp.ne.s32.totalorder (!%p3124_p10), %s4421_s12, 1 }
 0x40f   : > { %1258 = sbr.rel (%p3124_p10) target bundleno = 1949 (0x79d), region = 92 }
 0x414   : > { %v4149_v23 = vld [vmem:[#allocation3 + $0x38] sm:$0xff]   ;;  %v4150_v24 = vld [vmem:[#allocation3 + $0x30] sm:$0xff]   ;;  %v4151_v25 = vld [vmem:[#allocation3 + $0x28] sm:$0xff]  }
 0x415   : > { %3714 = vmatprep.subr.bf16.mxu0 %v4149_v23  ;;  %v4152_v26 = vld [vmem:[#allocation3 + $0x20] sm:$0xff]   ;;  %v1263_v27 = vld [vmem:[#allocation5] sm:$0xff]  ;;  %v4158_v30 = vld [vmem:[%s4660_s22 + $0x30] sm:$0xff]  }
 0x416   : > { %3715 = vmatpush3.bf16.msra.mxu0 %v4149_v23  ;;  %v1267_v28 = vunpack.c.l.s8.bf16 %v1263_v27  ;;  %v4157_v29 = vld [vmem:[%s4660_s22 + $0x38] sm:$0xff]   ;;  %v4153_v31 = vld [vmem:[#allocation3 + $0x18] sm:$0xff]   ;;  %v4159_v32 = vld [vmem:[%s4660_s22 + $0x28] sm:$0xff]   ;;  %v1268_v40 = vunpack.c.h.s8.bf16 %v1263_v27 }
 0x417   : > { %3716 = vmatprep.subr.bf16.mxu0 %v4150_v24  ;;  %3746 = vmatprep.subr.bf16.mxu1 %v4157_v29  ;;  %v4154_v33 = vld [vmem:[#allocation3 + $0x10] sm:$0xff]   ;;  %v4160_v34 = vld [vmem:[%s4660_s22 + $0x20] sm:$0xff]   ;;  %v4161_v36 = vld [vmem:[%s4660_s22 + $0x18] sm:$0xff]  }
 0x418   : > { %3730 = vmatprep.mubr.bf16.mxu0 %v1267_v28  ;;  %3747 = vmatpush3.bf16.msra.mxu1 %v4157_v29  ;;  %v4155_v35 = vld [vmem:[#allocation3 + $0x8] sm:$0xff]   ;;  %v4156_v37 = vld [vmem:[#allocation3] sm:$0xff]   ;;  %v4162_v38 = vld [vmem:[%s4660_s22 + $0x10] sm:$0xff]  }
 0x419   : > { %3748 = vmatprep.subr.bf16.mxu1 %v4158_v30  ;;  %v1264_v39 = vld [vmem:[#allocation5 + $0x8] sm:$0xff]  ;;  %v1265_v42 = vld [vmem:[#allocation5 + $0x10] sm:$0xff]  ;;  %v1266_v45 = vld [vmem:[#allocation5 + $0x18] sm:$0xff] }
 0x41a   : > { %3717 = vmatpush3.bf16.msra.mxu0 %v4150_v24  ;;  %v1269_v41 = vunpack.c.l.s8.bf16 %v1264_v39  ;;  %v1270_v43 = vunpack.c.h.s8.bf16 %v1264_v39  ;;  %v1271_v44 = vunpack.c.l.s8.bf16 %v1265_v42  ;;  %v1272_v46 = vunpack.c.h.s8.bf16 %v1265_v42  ;;  %v4163_v49 = vld [vmem:[%s4660_s22 + $0x8] sm:$0xff]   ;;  %v4164_v50 = vld [vmem:[%s4660_s22] sm:$0xff]   ;;  %v4165_v51 = vld [vmem:[%s4666_s19 + $0x38] sm:$0xff]  }
 0x41b   : > { %3718 = vmatprep.subr.bf16.mxu0 %v4151_v25  ;;  %v1273_v47 = vunpack.c.l.s8.bf16 %v1266_v45  ;;  %v1274_v48 = vunpack.c.h.s8.bf16 %v1266_v45  ;;  %v4166_v52 = vld [vmem:[%s4666_s19 + $0x30] sm:$0xff]   ;;  %v4167_v53 = vld [vmem:[%s4666_s19 + $0x28] sm:$0xff]   ;;  %v4168_v54 = vld [vmem:[%s4666_s19 + $0x20] sm:$0xff]  }
 0x41c   : > { %3749 = vmatpush3.bf16.msra.mxu1 %v4158_v30  ;;  %v4169_v55 = vld [vmem:[%s4666_s19 + $0x18] sm:$0xff]   ;;  %v4170_v7 = vld [vmem:[%s4666_s19 + $0x10] sm:$0xff]   ;;  %v4171_v17 = vld [vmem:[%s4666_s19 + $0x8] sm:$0xff]  }
 0x41d   : > { %3750 = vmatprep.subr.bf16.mxu1 %v4159_v32  ;;  %v4172_v18 = vld [vmem:[%s4666_s19] sm:$0xff]   ;;  %v4779_v20 = vld [vmem:[%s4678_s26] ss:$0 sm:$0xff] }
 0x41e   : > { %3719 = vmatpush3.bf16.msra.mxu0 %v4151_v25 }
 0x41f   : > { %3720 = vmatprep.subr.bf16.mxu0 %v4152_v26 }
 0x420   : > { %3751 = vmatpush3.bf16.msra.mxu1 %v4159_v32 }
 0x421   : > { %3752 = vmatprep.subr.bf16.mxu1 %v4160_v34 }
 0x422   : > { %3721 = vmatpush3.bf16.msra.mxu0 %v4152_v26 }
 0x423   : > { %3722 = vmatprep.subr.bf16.mxu0 %v4153_v31 }
 0x424   : > { %3753 = vmatpush3.bf16.msra.mxu1 %v4160_v34 }
 0x425   : > { %3754 = vmatprep.subr.bf16.mxu1 %v4161_v36 }
 0x426   : > { %3723 = vmatpush3.bf16.msra.mxu0 %v4153_v31 }
 0x427   : > { %3724 = vmatprep.subr.bf16.mxu0 %v4154_v33 }
 0x428   : > { %3755 = vmatpush3.bf16.msra.mxu1 %v4161_v36 }
 0x429   : > { %3756 = vmatprep.subr.bf16.mxu1 %v4162_v38 }
 0x42a   : > { %3725 = vmatpush3.bf16.msra.mxu0 %v4154_v33 }
 0x42b   : > { %3726 = vmatprep.subr.bf16.mxu0 %v4155_v35 }
 0x42c   : > { %3757 = vmatpush3.bf16.msra.mxu1 %v4162_v38 }
 0x42d   : > { %3758 = vmatprep.subr.bf16.mxu1 %v4163_v49 }
 0x42e   : > { %3727 = vmatpush3.bf16.msra.mxu0 %v4155_v35 }
 0x42f   : > { %3728 = vmatprep.subr.bf16.mxu0 %v4156_v37 }
 0x430   : > { %3759 = vmatpush3.bf16.msra.mxu1 %v4163_v49 }
 0x431   : > { %3760 = vmatprep.subr.bf16.mxu1 %v4164_v50 }
 0x432   : > { %3729 = vmatpush3.bf16.msra.mxu0 %v4156_v37 }
 0x433   : > { %3778 = vmatprep.subr.bf16.mxu0 %v4165_v51 }
 0x434   : > { %3761 = vmatpush3.bf16.msra.mxu1 %v4164_v50 }
 0x435   : > { %3731 = vmatmul.mubr.bf16.vlgmr.msra.gmra.mxu0 %v1268_v40  ;;  %3982 = vmatprep.subr.bf16.mxu1 %v4165_v51 }
 0x436   : > { %3734 = vmatprep.mubr.bf16.mxu0 %v1269_v41  ;;  %3779 = vmatpush3.bf16.msra.mxu0 %v4165_v51 }
 0x437   : > { %3780 = vmatprep.subr.bf16.mxu0 %v4166_v52 }
 0x43a   : > { %3781 = vmatpush3.bf16.msra.mxu0 %v4166_v52 }
 0x43b   : > { %3782 = vmatprep.subr.bf16.mxu0 %v4167_v53 }
 0x43d   : > { %3735 = vmatmul.mubr.bf16.gmra.mxu0 %v1270_v43 }
 0x43e   : > { %3738 = vmatprep.mubr.bf16.mxu0 %v1271_v44  ;;  %3783 = vmatpush3.bf16.msra.mxu0 %v4167_v53 }
 0x43f   : > { %3784 = vmatprep.subr.bf16.mxu0 %v4168_v54 }
 0x442   : > { %3785 = vmatpush3.bf16.msra.mxu0 %v4168_v54 }
 0x443   : > { %3786 = vmatprep.subr.bf16.mxu0 %v4169_v55 }
 0x445   : > { %3739 = vmatmul.mubr.bf16.gmra.mxu0 %v1272_v46 }
 0x446   : > { %3742 = vmatprep.mubr.bf16.mxu0 %v1273_v47  ;;  %3787 = vmatpush3.bf16.msra.mxu0 %v4169_v55 }
 0x447   : > { %3788 = vmatprep.subr.bf16.mxu0 %v4170_v7 }
 0x44a   : > { %3789 = vmatpush3.bf16.msra.mxu0 %v4170_v7 }
 0x44b   : > { %3790 = vmatprep.subr.bf16.mxu0 %v4171_v17 }
 0x44d   : > { %3743 = vmatmul.mubr.bf16.gmra.mxu0 %v1274_v48 }
 0x44e   : > { %3791 = vmatpush3.bf16.msra.mxu0 %v4171_v17 }
 0x44f   : > { %3792 = vmatprep.subr.bf16.mxu0 %v4172_v18 }
 0x452   : > { %3793 = vmatpush3.bf16.msra.mxu0 %v4172_v18 }
 0x4f5   : > { %v3732_v56 = vpop.f32.mrf.mxu0 }
 0x4f7   : > { %v1373_v57 = vpop.f32.mrf.mxu0 }
 0x4f9   : > { %v3733_v58 = vpop.f32.mrf.mxu0 }
 0x4fa   : > { %v1437_v61 = vpack.c.bf16 %v3733_v58, %v3732_v56 }
 0x4fb   : > { %v1376_v59 = vpop.f32.mrf.mxu0 }
 0x4fc   : > { %v1436_v60 = vpack.c.bf16 %v1376_v59, %v1373_v57 }
 0x4fd   : > { %v3736_v63 = vpop.f32.mrf.mxu0 }
 0x4fe   : > { %3762 = vmatprep.mubr.bf16.mxu1 %v1436_v60 }
 0x4ff   : > { %v1389_v0 = vpop.f32.mrf.mxu0  ;;  %3763 = vmatmul.mubr.bf16.vlgmr.msra.gmra.mxu1 %v1437_v61 }
 0x500   : > { %3990 = vmatpush3.bf16.msra.mxu1 %v4165_v51 }
 0x501   : > { %v3737_v1 = vpop.f32.mrf.mxu0  ;;  %3983 = vmatprep.subr.bf16.mxu1 %v4166_v52 }
 0x502   : > { %v1439_v4 = vpack.c.bf16 %v3737_v1, %v3736_v63 }
 0x503   : > { %v1392_v2 = vpop.f32.mrf.mxu0 }
 0x504   : > { %v1438_v3 = vpack.c.bf16 %v1392_v2, %v1389_v0  ;;  %3991 = vmatpush3.bf16.msra.mxu1 %v4166_v52 }
 0x505   : > { %v3740_v5 = vpop.f32.mrf.mxu0  ;;  %3984 = vmatprep.subr.bf16.mxu1 %v4167_v53 }
 0x506   : > { %3766 = vmatprep.mubr.bf16.mxu1 %v1438_v3 }
 0x507   : > { %v1405_v6 = vpop.f32.mrf.mxu0  ;;  %3767 = vmatmul.mubr.bf16.gmra.mxu1 %v1439_v4 }
 0x508   : > { %3992 = vmatpush3.bf16.msra.mxu1 %v4167_v53 }
 0x509   : > { %v3741_v8 = vpop.f32.mrf.mxu0  ;;  %3985 = vmatprep.subr.bf16.mxu1 %v4168_v54 }
 0x50a   : > { %v1441_v10 = vpack.c.bf16 %v3741_v8, %v3740_v5 }
 0x50b   : > { %v1408_v9 = vpop.f32.mrf.mxu0 }
 0x50c   : > { %v1440_v62 = vpack.c.bf16 %v1408_v9, %v1405_v6  ;;  %3993 = vmatpush3.bf16.msra.mxu1 %v4168_v54 }
 0x50d   : > { %v3744_v11 = vpop.f32.mrf.mxu0  ;;  %3986 = vmatprep.subr.bf16.mxu1 %v4169_v55 }
 0x50e   : > { %3770 = vmatprep.mubr.bf16.mxu1 %v1440_v62 }
 0x50f   : > { %v1421_v12 = vpop.f32.mrf.mxu0  ;;  %3771 = vmatmul.mubr.bf16.gmra.mxu1 %v1441_v10 }
 0x510   : > { %3994 = vmatpush3.bf16.msra.mxu1 %v4169_v55 }
 0x511   : > { %v3745_v13 = vpop.f32.mrf.mxu0  ;;  %3987 = vmatprep.subr.bf16.mxu1 %v4170_v7 }
 0x512   : > { %v1443_v16 = vpack.c.bf16 %v3745_v13, %v3744_v11 }
 0x513   : > { %v1424_v14 = vpop.f32.mrf.mxu0 }
 0x514   : > { %v1442_v15 = vpack.c.bf16 %v1424_v14, %v1421_v12  ;;  %3995 = vmatpush3.bf16.msra.mxu1 %v4170_v7 }
 0x515   : > { %3988 = vmatprep.subr.bf16.mxu1 %v4171_v17 }
 0x516   : > { %3774 = vmatprep.mubr.bf16.mxu1 %v1442_v15 }
 0x517   : > { %3775 = vmatmul.mubr.bf16.gmra.mxu1 %v1443_v16 }
 0x518   : > { %3996 = vmatpush3.bf16.msra.mxu1 %v4171_v17 }
 0x519   : > { %3989 = vmatprep.subr.bf16.mxu1 %v4172_v18 }
 0x51c   : > { %3997 = vmatpush3.bf16.msra.mxu1 %v4172_v18 }
 0x5bf   : > { %v3764_v19 = vpop.f32.mrf.mxu1 }
 0x5c0   : > { %v1558_v23 = vadd.f32 %v3764_v19, %v4779_v20 }
 0x5c1   : > { %v1549_v21 = vpop.f32.mrf.mxu1 }
 0x5c2   : > { %v1550_v22 = vadd.f32 %v4779_v20, %v1549_v21  ;;  %v1630_v30 = vmul.f32 0.2, %v1558_v23  ;;  %vm1614_vm3 = vcmp.gt.f32.partialorder %v1558_v23, 0.0 }
 0x5c3   : > { %v3765_v24 = vpop.f32.mrf.mxu1 }
 0x5c4   : > { %v1561_v25 = vadd.f32 %v3765_v24, %v4779_v20  ;;  %v1628_v27 = vmul.f32 0.2, %v1550_v22  ;;  %vm1612_vm2 = vcmp.gt.f32.partialorder %v1550_v22, 0.0  ;;  %v1646_v38 = vsel %vm1614_vm3, %v1558_v23, %v1630_v30 }
 0x5c5   : > { %v1552_v26 = vpop.f32.mrf.mxu1 }
 0x5c6   : > { %vm1615_vm1 = vcmp.gt.f32.partialorder %v1561_v25, 0.0  ;;  %v1631_v28 = vmul.f32 0.2, %v1561_v25  ;;  %v1553_v29 = vadd.f32 %v4779_v20, %v1552_v26  ;;  %v1644_v36 = vsel %vm1612_vm2, %v1550_v22, %v1628_v27 }
 0x5c7   : > { %v3768_v31 = vpop.f32.mrf.mxu1 }
 0x5c8   : > { %vm1613_vm4 = vcmp.gt.f32.partialorder %v1553_v29, 0.0  ;;  %v1629_v32 = vmul.f32 0.2, %v1553_v29  ;;  %v1647_v33 = vsel %vm1615_vm1, %v1561_v25, %v1631_v28  ;;  %v1574_v39 = vadd.f32 %v3768_v31, %v4779_v20 }
 0x5c9   : > { %v1565_v34 = vpop.f32.mrf.mxu1  ;;  %v1661_v42 = vpack.c.bf16 %v1647_v33, %v1646_v38 }
 0x5ca   : > { %v1566_v35 = vadd.f32 %v4779_v20, %v1565_v34  ;;  %v1645_v37 = vsel %vm1613_vm4, %v1553_v29, %v1629_v32  ;;  %v1634_v48 = vmul.f32 0.2, %v1574_v39  ;;  %vm1618_vm7 = vcmp.gt.f32.partialorder %v1574_v39, 0.0  ;;  %v4798_v29 = vld [vmem:[%s4683_s23] ss:$0 sm:$0xff] }
 0x5cb   : > { %v3769_v40 = vpop.f32.mrf.mxu1  ;;  %v1660_v41 = vpack.c.bf16 %v1645_v37, %v1644_v36 }
 0x5cc   : > { %v1577_v43 = vadd.f32 %v3769_v40, %v4779_v20  ;;  %v1632_v45 = vmul.f32 0.2, %v1566_v35  ;;  %vm1616_vm6 = vcmp.gt.f32.partialorder %v1566_v35, 0.0  ;;  %v1650_v59 = vsel %vm1618_vm7, %v1574_v39, %v1634_v48 }
 0x5cd   : > { %v1568_v44 = vpop.f32.mrf.mxu1  ;;  %3794 = vmatprep.mubr.bf16.mxu0 %v1660_v41 }
 0x5ce   : > { %vm1619_vm5 = vcmp.gt.f32.partialorder %v1577_v43, 0.0  ;;  %v1635_v46 = vmul.f32 0.2, %v1577_v43  ;;  %v1569_v47 = vadd.f32 %v4779_v20, %v1568_v44  ;;  %3795 = vmatmul.mubr.bf16.vlgmr.msra.gmra.mxu0 %v1661_v42  ;;  %v1648_v54 = vsel %vm1616_vm6, %v1566_v35, %v1632_v45 }
 0x5cf   : > { %v3772_v49 = vpop.f32.mrf.mxu1 }
 0x5d0   : > { %vm1617_vm8 = vcmp.gt.f32.partialorder %v1569_v47, 0.0  ;;  %v1633_v50 = vmul.f32 0.2, %v1569_v47  ;;  %v1651_v52 = vsel %vm1619_vm5, %v1577_v43, %v1635_v46  ;;  %v1590_v56 = vadd.f32 %v3772_v49, %v4779_v20 }
 0x5d1   : > { %v1581_v51 = vpop.f32.mrf.mxu1  ;;  %v1663_v61 = vpack.c.bf16 %v1651_v52, %v1650_v59 }
 0x5d2   : > { %v1582_v53 = vadd.f32 %v4779_v20, %v1581_v51  ;;  %v1649_v55 = vsel %vm1617_vm8, %v1569_v47, %v1633_v50  ;;  %v1638_v3 = vmul.f32 0.2, %v1590_v56  ;;  %vm1622_vm11 = vcmp.gt.f32.partialorder %v1590_v56, 0.0 }
 0x5d3   : > { %v3773_v57 = vpop.f32.mrf.mxu1  ;;  %v1662_v58 = vpack.c.bf16 %v1649_v55, %v1648_v54 }
 0x5d4   : > { %v1593_v60 = vadd.f32 %v3773_v57, %v4779_v20  ;;  %v1636_v0 = vmul.f32 0.2, %v1582_v53  ;;  %vm1620_vm10 = vcmp.gt.f32.partialorder %v1582_v53, 0.0  ;;  %v1654_v11 = vsel %vm1622_vm11, %v1590_v56, %v1638_v3 }
 0x5d5   : > { %v1584_v63 = vpop.f32.mrf.mxu1  ;;  %3798 = vmatprep.mubr.bf16.mxu0 %v1662_v58 }
 0x5d6   : > { %vm1623_vm9 = vcmp.gt.f32.partialorder %v1593_v60, 0.0  ;;  %v1639_v1 = vmul.f32 0.2, %v1593_v60  ;;  %v1585_v2 = vadd.f32 %v4779_v20, %v1584_v63  ;;  %3799 = vmatmul.mubr.bf16.gmra.mxu0 %v1663_v61  ;;  %v1652_v62 = vsel %vm1620_vm10, %v1582_v53, %v1636_v0 }
 0x5d7   : > { %v3776_v4 = vpop.f32.mrf.mxu1 }
 0x5d8   : > { %vm1621_vm12 = vcmp.gt.f32.partialorder %v1585_v2, 0.0  ;;  %v1637_v5 = vmul.f32 0.2, %v1585_v2  ;;  %v1655_v6 = vsel %vm1623_vm9, %v1593_v60, %v1639_v1  ;;  %v1606_v12 = vadd.f32 %v3776_v4, %v4779_v20 }
 0x5d9   : > { %v1597_v8 = vpop.f32.mrf.mxu1  ;;  %v1665_v15 = vpack.c.bf16 %v1655_v6, %v1654_v11 }
 0x5da   : > { %v1598_v9 = vadd.f32 %v4779_v20, %v1597_v8  ;;  %v1653_v10 = vsel %vm1621_vm12, %v1585_v2, %v1637_v5  ;;  %v1642_v21 = vmul.f32 0.2, %v1606_v12  ;;  %vm1626_vm15 = vcmp.gt.f32.partialorder %v1606_v12, 0.0 }
 0x5db   : > { %v3777_v13 = vpop.f32.mrf.mxu1  ;;  %v1664_v14 = vpack.c.bf16 %v1653_v10, %v1652_v62 }
 0x5dc   : > { %v1609_v16 = vadd.f32 %v3777_v13, %v4779_v20  ;;  %v1640_v17 = vmul.f32 0.2, %v1598_v9  ;;  %vm1624_vm14 = vcmp.gt.f32.partialorder %v1598_v9, 0.0  ;;  %v1658_v27 = vsel %vm1626_vm15, %v1606_v12, %v1642_v21 }
 0x5dd   : > { %v1600_v7 = vpop.f32.mrf.mxu1  ;;  %3802 = vmatprep.mubr.bf16.mxu1 %v1664_v14 }
 0x5de   : > { %vm1627_vm13 = vcmp.gt.f32.partialorder %v1609_v16, 0.0  ;;  %v1643_v18 = vmul.f32 0.2, %v1609_v16  ;;  %v1601_v19 = vadd.f32 %v4779_v20, %v1600_v7  ;;  %3803 = vmatmul.mubr.bf16.vlgmr.msra.gmra.mxu1 %v1665_v15  ;;  %v1656_v24 = vsel %vm1624_vm14, %v1598_v9, %v1640_v17 }
 0x5e0   : > { %vm1625_vm0 = vcmp.gt.f32.partialorder %v1601_v19, 0.0  ;;  %v1641_v22 = vmul.f32 0.2, %v1601_v19  ;;  %v1659_v23 = vsel %vm1627_vm13, %v1609_v16, %v1643_v18 }
 0x5e1   : > { %v1667_v28 = vpack.c.bf16 %v1659_v23, %v1658_v27 }
 0x5e2   : > { %v1657_v25 = vsel %vm1625_vm0, %v1601_v19, %v1641_v22 }
 0x5e3   : > { %v1666_v26 = vpack.c.bf16 %v1657_v25, %v1656_v24 }
 0x5e5   : > { %3806 = vmatprep.mubr.bf16.mxu1 %v1666_v26 }
 0x5e6   : > { %3807 = vmatmul.mubr.bf16.gmra.mxu1 %v1667_v28 }
 0x68e   : > { %v3796_v30 = vpop.f32.mrf.mxu0 }
 0x68f   : > { %v1782_v31 = vadd.f32 %v3796_v30, %v4798_v29 }
 0x690   : > { %v1773_v20 = vpop.f32.mrf.mxu0 }
 0x691   : > { %v1774_v32 = vadd.f32 %v4798_v29, %v1773_v20  ;;  %v1854_v33 = vmul.f32 0.2, %v1782_v31  ;;  %vm1838_vm1 = vcmp.gt.f32.partialorder %v1782_v31, 0.0 }
 0x692   : > { %v3797_v34 = vpop.f32.mrf.mxu0 }
 0x693   : > { %v1785_v35 = vadd.f32 %v3797_v34, %v4798_v29  ;;  %v1852_v37 = vmul.f32 0.2, %v1774_v32  ;;  %v1870_v40 = vsel %vm1838_vm1, %v1782_v31, %v1854_v33  ;;  %vm1836_vm3 = vcmp.gt.f32.partialorder %v1774_v32, 0.0 }
 0x694   : > { %v1776_v36 = vpop.f32.mrf.mxu0 }
 0x695   : > { %vm1839_vm2 = vcmp.gt.f32.partialorder %v1785_v35, 0.0  ;;  %v1855_v38 = vmul.f32 0.2, %v1785_v35  ;;  %v1777_v39 = vadd.f32 %v4798_v29, %v1776_v36  ;;  %v1868_v47 = vsel %vm1836_vm3, %v1774_v32, %v1852_v37 }
 0x696   : > { %v3800_v41 = vpop.f32.mrf.mxu0 }
 0x697   : > { %v1871_v42 = vsel %vm1839_vm2, %v1785_v35, %v1855_v38  ;;  %vm1837_vm4 = vcmp.gt.f32.partialorder %v1777_v39, 0.0  ;;  %v1853_v43 = vmul.f32 0.2, %v1777_v39  ;;  %v1798_v44 = vadd.f32 %v3800_v41, %v4798_v29 }
 0x698   : > { %v4805_v45 = vpack.c.bf16 %v1871_v42, %v1870_v40  ;;  %v1789_v46 = vpop.f32.mrf.mxu0 }
 0x699   : > { %v1869_v48 = vsel %vm1837_vm4, %v1777_v39, %v1853_v43  ;;  %v1790_v49 = vadd.f32 %v4798_v29, %v1789_v46  ;;  %v1858_v51 = vmul.f32 0.2, %v1798_v44  ;;  %vm1842_vm5 = vcmp.gt.f32.partialorder %v1798_v44, 0.0 }
 0x69a   : > { %3404 = vst [vmem:[#allocation2 + $0x8] sm:$0xff] %v4805_v45   ;;  %v4809_v50 = vpack.c.bf16 %v1869_v48, %v1868_v47  ;;  %v3801_v52 = vpop.f32.mrf.mxu0 }
 0x69b   : > { %v1801_v53 = vadd.f32 %v3801_v52, %v4798_v29  ;;  %v1856_v55 = vmul.f32 0.2, %v1790_v49  ;;  %v1874_v58 = vsel %vm1842_vm5, %v1798_v44, %v1858_v51  ;;  %vm1840_vm7 = vcmp.gt.f32.partialorder %v1790_v49, 0.0 }
 0x69c   : > { %3321 = vst [vmem:[#allocation2] sm:$0xff] %v4809_v50   ;;  %v1792_v54 = vpop.f32.mrf.mxu0 }
 0x69d   : > { %vm1843_vm6 = vcmp.gt.f32.partialorder %v1801_v53, 0.0  ;;  %v1859_v56 = vmul.f32 0.2, %v1801_v53  ;;  %v1793_v57 = vadd.f32 %v4798_v29, %v1792_v54  ;;  %v1872_v2 = vsel %vm1840_vm7, %v1790_v49, %v1856_v55 }
 0x69e   : > { %v3804_v59 = vpop.f32.mrf.mxu1 }
 0x69f   : > { %v1875_v60 = vsel %vm1843_vm6, %v1801_v53, %v1859_v56  ;;  %vm1841_vm8 = vcmp.gt.f32.partialorder %v1793_v57, 0.0  ;;  %v1857_v61 = vmul.f32 0.2, %v1793_v57  ;;  %v1814_v63 = vadd.f32 %v3804_v59, %v4798_v29 }
 0x6a0   : > { %v4815_v0 = vpack.c.bf16 %v1875_v60, %v1874_v58  ;;  %v1805_v1 = vpop.f32.mrf.mxu1 }
 0x6a1   : > { %v1873_v3 = vsel %vm1841_vm8, %v1793_v57, %v1857_v61  ;;  %v1806_v4 = vadd.f32 %v4798_v29, %v1805_v1  ;;  %v1862_v6 = vmul.f32 0.2, %v1814_v63  ;;  %vm1846_vm9 = vcmp.gt.f32.partialorder %v1814_v63, 0.0 }
 0x6a2   : > { %3406 = vst [vmem:[#allocation2 + $0x18] sm:$0xff] %v4815_v0   ;;  %v1886_v5 = vpack.c.bf16 %v1873_v3, %v1872_v2  ;;  %v3805_v8 = vpop.f32.mrf.mxu1 }
 0x6a3   : > { %v1817_v9 = vadd.f32 %v3805_v8, %v4798_v29  ;;  %v1860_v10 = vmul.f32 0.2, %v1806_v4  ;;  %v1878_v13 = vsel %vm1846_vm9, %v1814_v63, %v1862_v6  ;;  %vm1844_vm11 = vcmp.gt.f32.partialorder %v1806_v4, 0.0 }
 0x6a4   : > { %3405 = vst [vmem:[#allocation2 + $0x10] sm:$0xff] %v1886_v5   ;;  %v1808_v62 = vpop.f32.mrf.mxu1 }
 0x6a5   : > { %vm1847_vm10 = vcmp.gt.f32.partialorder %v1817_v9, 0.0  ;;  %v1863_v11 = vmul.f32 0.2, %v1817_v9  ;;  %v1809_v12 = vadd.f32 %v4798_v29, %v1808_v62  ;;  %v1876_v19 = vsel %vm1844_vm11, %v1806_v4, %v1860_v10 }
 0x6a6   : > { %v3808_v14 = vpop.f32.mrf.mxu1 }
 0x6a7   : > { %v1879_v15 = vsel %vm1847_vm10, %v1817_v9, %v1863_v11  ;;  %vm1845_vm12 = vcmp.gt.f32.partialorder %v1809_v12, 0.0  ;;  %v1861_v16 = vmul.f32 0.2, %v1809_v12  ;;  %v1830_v7 = vadd.f32 %v3808_v14, %v4798_v29 }
 0x6a8   : > { %v1889_v17 = vpack.c.bf16 %v1879_v15, %v1878_v13  ;;  %v1821_v18 = vpop.f32.mrf.mxu1 }
 0x6a9   : > { %v1877_v21 = vsel %vm1845_vm12, %v1809_v12, %v1861_v16  ;;  %v1822_v22 = vadd.f32 %v4798_v29, %v1821_v18  ;;  %v1866_v25 = vmul.f32 0.2, %v1830_v7  ;;  %vm1850_vm13 = vcmp.gt.f32.partialorder %v1830_v7, 0.0 }
 0x6aa   : > { %3408 = vst [vmem:[#allocation2 + $0x28] sm:$0xff] %v1889_v17   ;;  %v1888_v23 = vpack.c.bf16 %v1877_v21, %v1876_v19  ;;  %v3809_v24 = vpop.f32.mrf.mxu1 }
 0x6ab   : > { %v1833_v26 = vadd.f32 %v3809_v24, %v4798_v29  ;;  %v1864_v28 = vmul.f32 0.2, %v1822_v22  ;;  %vm1848_vm15 = vcmp.gt.f32.partialorder %v1822_v22, 0.0  ;;  %v1882_v20 = vsel %vm1850_vm13, %v1830_v7, %v1866_v25 }
 0x6ac   : > { %3407 = vst [vmem:[#allocation2 + $0x20] sm:$0xff] %v1888_v23   ;;  %v1824_v27 = vpop.f32.mrf.mxu1 }
 0x6ad   : > { %vm1851_vm14 = vcmp.gt.f32.partialorder %v1833_v26, 0.0  ;;  %v1867_v30 = vmul.f32 0.2, %v1833_v26  ;;  %v1825_v31 = vadd.f32 %v4798_v29, %v1824_v27  ;;  %v1880_v35 = vsel %vm1848_vm15, %v1822_v22, %v1864_v28 }
 0x6af   : > { %v1883_v32 = vsel %vm1851_vm14, %v1833_v26, %v1867_v30  ;;  %vm1849_vm0 = vcmp.gt.f32.partialorder %v1825_v31, 0.0  ;;  %v1865_v33 = vmul.f32 0.2, %v1825_v31 }
 0x6b0   : > { %v1891_v34 = vpack.c.bf16 %v1883_v32, %v1882_v20  ;;  %1971 = sbr.rel (%p3167_p11) target bundleno = 1949 (0x79d), region = 96 }
 0x6b1   : > { %v1881_v36 = vsel %vm1849_vm0, %v1825_v31, %v1865_v33 }
 0x6b2   : > { %3410 = vst [vmem:[#allocation2 + $0x38] sm:$0xff] %v1891_v34   ;;  %v1890_v37 = vpack.c.bf16 %v1881_v36, %v1880_v35 }
 0x6b4   : > { %3409 = vst [vmem:[#allocation2 + $0x30] sm:$0xff] %v1890_v37  }
 0x6b5   : > { %v4443_v38 = vmov 0.0   ;;  %vm4444_vm1 = vmmov 0   ;;  %v1973_v29 = vld [vmem:[%s4944_s6] sm:$0xf] }
 0x6b6   : > { %3810 = vmatprep.subr.bf16.mxu0 %v4443_v38  ;;  %3826 = vmatprep.mubr.msk.bf16.mxu0 %vm4444_vm1, %v4443_v38  ;;  %v1972_v39 = vld [vmem:[#allocation4] sm:$0xff] }
 0x6b7   : > { %3811 = vmatpush3.bf16.msra.mxu0 %v1891_v34 }
 0x6b8   : > { %3812 = vmatprep.subr.bf16.mxu0 %v4443_v38 }
 0x6bb   : > { %3813 = vmatpush3.bf16.msra.mxu0 %v1890_v37 }
 0x6bc   : > { %3814 = vmatprep.subr.bf16.mxu0 %v4443_v38 }
 0x6bf   : > { %3815 = vmatpush3.bf16.msra.mxu0 %v1889_v17 }
 0x6c0   : > { %3816 = vmatprep.subr.bf16.mxu0 %v4443_v38 }
 0x6c3   : > { %3817 = vmatpush3.bf16.msra.mxu0 %v1888_v23 }
 0x6c4   : > { %3818 = vmatprep.subr.bf16.mxu0 %v4443_v38 }
 0x6c7   : > { %3819 = vmatpush3.bf16.msra.mxu0 %v4815_v0 }
 0x6c8   : > { %3820 = vmatprep.subr.bf16.mxu0 %v4443_v38 }
 0x6cb   : > { %3821 = vmatpush3.bf16.msra.mxu0 %v1886_v5 }
 0x6cc   : > { %3822 = vmatprep.subr.bf16.mxu0 %v4443_v38 }
 0x6cf   : > { %3823 = vmatpush3.bf16.msra.mxu0 %v4805_v45 }
 0x6d0   : > { %3824 = vmatprep.subr.bf16.mxu0 %v4443_v38 }
 0x6d3   : > { %3825 = vmatpush3.bf16.msra.mxu0 %v4809_v50 }
 0x6d6   : > { %3827 = vmatmul.mubr.bf16.vlgmr.msra.gmra.mxu0 %v1973_v29 }
 0x796   : > { %v2008_v40 = vpop.f32.mrf.mxu0 }
 0x797   : > { %v2014_v41 = vadd.f32 %v2008_v40, %v1972_v39 }
 0x798   : > { %v3828_v42 = vpop.f32.mrf.mxu0 }
 0x799   : > { %2015 = vst [vmem:[#allocation4] sm:$0xff] %v2014_v41 }
 0x79a   : > { %v2011_v43 = vpop.f32.mrf.mxu0 }
 0x79c   : > { %v3829_v44 = vpop.f32.mrf.mxu0 }
 0x79d PF: > { %p2016_p7 = scmp.gt.s32.totalorder %s4421_s12, 0  ;;  %p2017_p0 = scmp.eq.s32.totalorder %s4996_s29, 0 }
 0x79f   : > { %p2018_p6 = pnand %p2017_p0, %p2016_p7 }
 0x7a0   : > { %p3210_p8 = scmp.ne.s32.totalorder (!%p2018_p6), %s4421_s12, 1 }
 0x7a1   : > { %2021 = sbr.rel (%p2018_p6) target bundleno = 2863 (0xb2f), region = 100 }
 0x7a6   : > { %v4173_v45 = vld [vmem:[#allocation2 + $0x38] sm:$0xff]   ;;  %v4174_v46 = vld [vmem:[#allocation2 + $0x30] sm:$0xff]   ;;  %v4175_v47 = vld [vmem:[#allocation2 + $0x28] sm:$0xff]  }
 0x7a7   : > { %3830 = vmatprep.subr.bf16.mxu0 %v4173_v45  ;;  %v4176_v48 = vld [vmem:[#allocation2 + $0x20] sm:$0xff]   ;;  %v2026_v49 = vld [vmem:[#allocation5] sm:$0xff]  ;;  %v4182_v52 = vld [vmem:[%s4660_s22 + $0x30] sm:$0xff]  }
 0x7a8   : > { %3831 = vmatpush3.bf16.msra.mxu0 %v4173_v45  ;;  %v2030_v50 = vunpack.c.l.s8.bf16 %v2026_v49  ;;  %v4181_v51 = vld [vmem:[%s4660_s22 + $0x38] sm:$0xff]   ;;  %v4177_v53 = vld [vmem:[#allocation2 + $0x18] sm:$0xff]   ;;  %v4183_v54 = vld [vmem:[%s4660_s22 + $0x28] sm:$0xff]   ;;  %v2031_v63 = vunpack.c.h.s8.bf16 %v2026_v49 }
 0x7a9   : > { %3832 = vmatprep.subr.bf16.mxu0 %v4174_v46  ;;  %3862 = vmatprep.subr.bf16.mxu1 %v4181_v51  ;;  %v4178_v55 = vld [vmem:[#allocation2 + $0x10] sm:$0xff]   ;;  %v4184_v56 = vld [vmem:[%s4660_s22 + $0x20] sm:$0xff]   ;;  %v4185_v58 = vld [vmem:[%s4660_s22 + $0x18] sm:$0xff]  }
 0x7aa   : > { %3846 = vmatprep.mubr.bf16.mxu0 %v2030_v50  ;;  %3863 = vmatpush3.bf16.msra.mxu1 %v4181_v51  ;;  %v4179_v57 = vld [vmem:[#allocation2 + $0x8] sm:$0xff]   ;;  %v4180_v59 = vld [vmem:[#allocation2] sm:$0xff]   ;;  %v4186_v60 = vld [vmem:[%s4660_s22 + $0x10] sm:$0xff]  }
 0x7ab   : > { %3864 = vmatprep.subr.bf16.mxu1 %v4182_v52  ;;  %v2027_v61 = vld [vmem:[#allocation5 + $0x8] sm:$0xff]  ;;  %v2028_v1 = vld [vmem:[#allocation5 + $0x10] sm:$0xff]  ;;  %v2029_v4 = vld [vmem:[#allocation5 + $0x18] sm:$0xff] }
 0x7ac   : > { %3833 = vmatpush3.bf16.msra.mxu0 %v4174_v46  ;;  %v2032_v0 = vunpack.c.l.s8.bf16 %v2027_v61  ;;  %v2033_v2 = vunpack.c.h.s8.bf16 %v2027_v61  ;;  %v2034_v3 = vunpack.c.l.s8.bf16 %v2028_v1  ;;  %v2035_v5 = vunpack.c.h.s8.bf16 %v2028_v1  ;;  %v4187_v9 = vld [vmem:[%s4660_s22 + $0x8] sm:$0xff]   ;;  %v4188_v62 = vld [vmem:[%s4660_s22] sm:$0xff]   ;;  %v4189_v10 = vld [vmem:[%s4666_s19 + $0x38] sm:$0xff]  }
 0x7ad   : > { %3834 = vmatprep.subr.bf16.mxu0 %v4175_v47  ;;  %v2036_v6 = vunpack.c.l.s8.bf16 %v2029_v4  ;;  %v2037_v8 = vunpack.c.h.s8.bf16 %v2029_v4  ;;  %v4190_v11 = vld [vmem:[%s4666_s19 + $0x30] sm:$0xff]   ;;  %v4191_v12 = vld [vmem:[%s4666_s19 + $0x28] sm:$0xff]   ;;  %v4192_v13 = vld [vmem:[%s4666_s19 + $0x20] sm:$0xff]  }
 0x7ae   : > { %3865 = vmatpush3.bf16.msra.mxu1 %v4182_v52  ;;  %v4193_v14 = vld [vmem:[%s4666_s19 + $0x18] sm:$0xff]   ;;  %v4194_v29 = vld [vmem:[%s4666_s19 + $0x10] sm:$0xff]   ;;  %v4195_v39 = vld [vmem:[%s4666_s19 + $0x8] sm:$0xff]  }
 0x7af   : > { %3866 = vmatprep.subr.bf16.mxu1 %v4183_v54  ;;  %v4196_v40 = vld [vmem:[%s4666_s19] sm:$0xff]   ;;  %v4851_v42 = vld [vmem:[%s4678_s26] ss:$0 sm:$0xff] }
 0x7b0   : > { %3835 = vmatpush3.bf16.msra.mxu0 %v4175_v47 }
 0x7b1   : > { %3836 = vmatprep.subr.bf16.mxu0 %v4176_v48 }
 0x7b2   : > { %3867 = vmatpush3.bf16.msra.mxu1 %v4183_v54 }
 0x7b3   : > { %3868 = vmatprep.subr.bf16.mxu1 %v4184_v56 }
 0x7b4   : > { %3837 = vmatpush3.bf16.msra.mxu0 %v4176_v48 }
 0x7b5   : > { %3838 = vmatprep.subr.bf16.mxu0 %v4177_v53 }
 0x7b6   : > { %3869 = vmatpush3.bf16.msra.mxu1 %v4184_v56 }
 0x7b7   : > { %3870 = vmatprep.subr.bf16.mxu1 %v4185_v58 }
 0x7b8   : > { %3839 = vmatpush3.bf16.msra.mxu0 %v4177_v53 }
 0x7b9   : > { %3840 = vmatprep.subr.bf16.mxu0 %v4178_v55 }
 0x7ba   : > { %3871 = vmatpush3.bf16.msra.mxu1 %v4185_v58 }
 0x7bb   : > { %3872 = vmatprep.subr.bf16.mxu1 %v4186_v60 }
 0x7bc   : > { %3841 = vmatpush3.bf16.msra.mxu0 %v4178_v55 }
 0x7bd   : > { %3842 = vmatprep.subr.bf16.mxu0 %v4179_v57 }
 0x7be   : > { %3873 = vmatpush3.bf16.msra.mxu1 %v4186_v60 }
 0x7bf   : > { %3874 = vmatprep.subr.bf16.mxu1 %v4187_v9 }
 0x7c0   : > { %3843 = vmatpush3.bf16.msra.mxu0 %v4179_v57 }
 0x7c1   : > { %3844 = vmatprep.subr.bf16.mxu0 %v4180_v59 }
 0x7c2   : > { %3875 = vmatpush3.bf16.msra.mxu1 %v4187_v9 }
 0x7c3   : > { %3876 = vmatprep.subr.bf16.mxu1 %v4188_v62 }
 0x7c4   : > { %3845 = vmatpush3.bf16.msra.mxu0 %v4180_v59 }
 0x7c5   : > { %3894 = vmatprep.subr.bf16.mxu0 %v4189_v10 }
 0x7c6   : > { %3877 = vmatpush3.bf16.msra.mxu1 %v4188_v62 }
 0x7c7   : > { %3847 = vmatmul.mubr.bf16.vlgmr.msra.gmra.mxu0 %v2031_v63  ;;  %3998 = vmatprep.subr.bf16.mxu1 %v4189_v10 }
 0x7c8   : > { %3850 = vmatprep.mubr.bf16.mxu0 %v2032_v0  ;;  %3895 = vmatpush3.bf16.msra.mxu0 %v4189_v10 }
 0x7c9   : > { %3896 = vmatprep.subr.bf16.mxu0 %v4190_v11 }
 0x7cc   : > { %3897 = vmatpush3.bf16.msra.mxu0 %v4190_v11 }
 0x7cd   : > { %3898 = vmatprep.subr.bf16.mxu0 %v4191_v12 }
 0x7cf   : > { %3851 = vmatmul.mubr.bf16.gmra.mxu0 %v2033_v2 }
 0x7d0   : > { %3854 = vmatprep.mubr.bf16.mxu0 %v2034_v3  ;;  %3899 = vmatpush3.bf16.msra.mxu0 %v4191_v12 }
 0x7d1   : > { %3900 = vmatprep.subr.bf16.mxu0 %v4192_v13 }
 0x7d4   : > { %3901 = vmatpush3.bf16.msra.mxu0 %v4192_v13 }
 0x7d5   : > { %3902 = vmatprep.subr.bf16.mxu0 %v4193_v14 }
 0x7d7   : > { %3855 = vmatmul.mubr.bf16.gmra.mxu0 %v2035_v5 }
 0x7d8   : > { %3858 = vmatprep.mubr.bf16.mxu0 %v2036_v6  ;;  %3903 = vmatpush3.bf16.msra.mxu0 %v4193_v14 }
 0x7d9   : > { %3904 = vmatprep.subr.bf16.mxu0 %v4194_v29 }
 0x7dc   : > { %3905 = vmatpush3.bf16.msra.mxu0 %v4194_v29 }
 0x7dd   : > { %3906 = vmatprep.subr.bf16.mxu0 %v4195_v39 }
 0x7df   : > { %3859 = vmatmul.mubr.bf16.gmra.mxu0 %v2037_v8 }
 0x7e0   : > { %3907 = vmatpush3.bf16.msra.mxu0 %v4195_v39 }
 0x7e1   : > { %3908 = vmatprep.subr.bf16.mxu0 %v4196_v40 }
 0x7e4   : > { %3909 = vmatpush3.bf16.msra.mxu0 %v4196_v40 }
 0x887   : > { %v3848_v15 = vpop.f32.mrf.mxu0 }
 0x889   : > { %v2136_v16 = vpop.f32.mrf.mxu0 }
 0x88b   : > { %v3849_v7 = vpop.f32.mrf.mxu0 }
 0x88c   : > { %v2200_v19 = vpack.c.bf16 %v3849_v7, %v3848_v15 }
 0x88d   : > { %v2139_v17 = vpop.f32.mrf.mxu0 }
 0x88e   : > { %v2199_v18 = vpack.c.bf16 %v2139_v17, %v2136_v16 }
 0x88f   : > { %v3852_v21 = vpop.f32.mrf.mxu0 }
 0x890   : > { %3878 = vmatprep.mubr.bf16.mxu1 %v2199_v18 }
 0x891   : > { %v2152_v22 = vpop.f32.mrf.mxu0  ;;  %3879 = vmatmul.mubr.bf16.vlgmr.msra.gmra.mxu1 %v2200_v19 }
 0x892   : > { %4006 = vmatpush3.bf16.msra.mxu1 %v4189_v10 }
 0x893   : > { %v3853_v23 = vpop.f32.mrf.mxu0  ;;  %3999 = vmatprep.subr.bf16.mxu1 %v4190_v11 }
 0x894   : > { %v2202_v26 = vpack.c.bf16 %v3853_v23, %v3852_v21 }
 0x895   : > { %v2155_v24 = vpop.f32.mrf.mxu0 }
 0x896   : > { %v2201_v25 = vpack.c.bf16 %v2155_v24, %v2152_v22  ;;  %4007 = vmatpush3.bf16.msra.mxu1 %v4190_v11 }
 0x897   : > { %v3856_v27 = vpop.f32.mrf.mxu0  ;;  %4000 = vmatprep.subr.bf16.mxu1 %v4191_v12 }
 0x898   : > { %3882 = vmatprep.mubr.bf16.mxu1 %v2201_v25 }
 0x899   : > { %v2168_v28 = vpop.f32.mrf.mxu0  ;;  %3883 = vmatmul.mubr.bf16.gmra.mxu1 %v2202_v26 }
 0x89a   : > { %4008 = vmatpush3.bf16.msra.mxu1 %v4191_v12 }
 0x89b   : > { %v3857_v30 = vpop.f32.mrf.mxu0  ;;  %4001 = vmatprep.subr.bf16.mxu1 %v4192_v13 }
 0x89c   : > { %v2204_v32 = vpack.c.bf16 %v3857_v30, %v3856_v27 }
 0x89d   : > { %v2171_v31 = vpop.f32.mrf.mxu0 }
 0x89e   : > { %v2203_v20 = vpack.c.bf16 %v2171_v31, %v2168_v28  ;;  %4009 = vmatpush3.bf16.msra.mxu1 %v4192_v13 }
 0x89f   : > { %v3860_v33 = vpop.f32.mrf.mxu0  ;;  %4002 = vmatprep.subr.bf16.mxu1 %v4193_v14 }
 0x8a0   : > { %3886 = vmatprep.mubr.bf16.mxu1 %v2203_v20 }
 0x8a1   : > { %v2184_v34 = vpop.f32.mrf.mxu0  ;;  %3887 = vmatmul.mubr.bf16.gmra.mxu1 %v2204_v32 }
 0x8a2   : > { %4010 = vmatpush3.bf16.msra.mxu1 %v4193_v14 }
 0x8a3   : > { %v3861_v35 = vpop.f32.mrf.mxu0  ;;  %4003 = vmatprep.subr.bf16.mxu1 %v4194_v29 }
 0x8a4   : > { %v2206_v38 = vpack.c.bf16 %v3861_v35, %v3860_v33 }
 0x8a5   : > { %v2187_v36 = vpop.f32.mrf.mxu0 }
 0x8a6   : > { %v2205_v37 = vpack.c.bf16 %v2187_v36, %v2184_v34  ;;  %4011 = vmatpush3.bf16.msra.mxu1 %v4194_v29 }
 0x8a7   : > { %4004 = vmatprep.subr.bf16.mxu1 %v4195_v39 }
 0x8a8   : > { %3890 = vmatprep.mubr.bf16.mxu1 %v2205_v37 }
 0x8a9   : > { %3891 = vmatmul.mubr.bf16.gmra.mxu1 %v2206_v38 }
 0x8aa   : > { %4012 = vmatpush3.bf16.msra.mxu1 %v4195_v39 }
 0x8ab   : > { %4005 = vmatprep.subr.bf16.mxu1 %v4196_v40 }
 0x8ae   : > { %4013 = vmatpush3.bf16.msra.mxu1 %v4196_v40 }
 0x951   : > { %v3880_v41 = vpop.f32.mrf.mxu1 }
 0x952   : > { %v2321_v45 = vadd.f32 %v3880_v41, %v4851_v42 }
 0x953   : > { %v2312_v43 = vpop.f32.mrf.mxu1 }
 0x954   : > { %v2313_v44 = vadd.f32 %v4851_v42, %v2312_v43  ;;  %v2393_v52 = vmul.f32 0.2, %v2321_v45  ;;  %vm2377_vm4 = vcmp.gt.f32.partialorder %v2321_v45, 0.0 }
 0x955   : > { %v3881_v46 = vpop.f32.mrf.mxu1 }
 0x956   : > { %v2324_v47 = vadd.f32 %v3881_v46, %v4851_v42  ;;  %v2391_v49 = vmul.f32 0.2, %v2313_v44  ;;  %vm2375_vm3 = vcmp.gt.f32.partialorder %v2313_v44, 0.0  ;;  %v2409_v60 = vsel %vm2377_vm4, %v2321_v45, %v2393_v52 }
 0x957   : > { %v2315_v48 = vpop.f32.mrf.mxu1 }
 0x958   : > { %vm2378_vm2 = vcmp.gt.f32.partialorder %v2324_v47, 0.0  ;;  %v2394_v50 = vmul.f32 0.2, %v2324_v47  ;;  %v2316_v51 = vadd.f32 %v4851_v42, %v2315_v48  ;;  %v2407_v58 = vsel %vm2375_vm3, %v2313_v44, %v2391_v49 }
 0x959   : > { %v3884_v53 = vpop.f32.mrf.mxu1 }
 0x95a   : > { %vm2376_vm5 = vcmp.gt.f32.partialorder %v2316_v51, 0.0  ;;  %v2392_v54 = vmul.f32 0.2, %v2316_v51  ;;  %v2410_v55 = vsel %vm2378_vm2, %v2324_v47, %v2394_v50  ;;  %v2337_v61 = vadd.f32 %v3884_v53, %v4851_v42 }
 0x95b   : > { %v2328_v56 = vpop.f32.mrf.mxu1  ;;  %v2424_v1 = vpack.c.bf16 %v2410_v55, %v2409_v60 }
 0x95c   : > { %v2329_v57 = vadd.f32 %v4851_v42, %v2328_v56  ;;  %v2408_v59 = vsel %vm2376_vm5, %v2316_v51, %v2392_v54  ;;  %v2397_v8 = vmul.f32 0.2, %v2337_v61  ;;  %vm2381_vm8 = vcmp.gt.f32.partialorder %v2337_v61, 0.0  ;;  %v4870_v51 = vld [vmem:[%s4683_s23] ss:$0 sm:$0xff] }
 0x95d   : > { %v3885_v63 = vpop.f32.mrf.mxu1  ;;  %v2423_v0 = vpack.c.bf16 %v2408_v59, %v2407_v58 }
 0x95e   : > { %v2340_v2 = vadd.f32 %v3885_v63, %v4851_v42  ;;  %v2395_v4 = vmul.f32 0.2, %v2329_v57  ;;  %vm2379_vm7 = vcmp.gt.f32.partialorder %v2329_v57, 0.0  ;;  %v2413_v17 = vsel %vm2381_vm8, %v2337_v61, %v2397_v8 }
 0x95f   : > { %v2331_v3 = vpop.f32.mrf.mxu1  ;;  %3910 = vmatprep.mubr.bf16.mxu0 %v2423_v0 }
 0x960   : > { %vm2382_vm6 = vcmp.gt.f32.partialorder %v2340_v2, 0.0  ;;  %v2398_v5 = vmul.f32 0.2, %v2340_v2  ;;  %v2332_v6 = vadd.f32 %v4851_v42, %v2331_v3  ;;  %3911 = vmatmul.mubr.bf16.vlgmr.msra.gmra.mxu0 %v2424_v1  ;;  %v2411_v13 = vsel %vm2379_vm7, %v2329_v57, %v2395_v4 }
 0x961   : > { %v3888_v9 = vpop.f32.mrf.mxu1 }
 0x962   : > { %vm2380_vm9 = vcmp.gt.f32.partialorder %v2332_v6, 0.0  ;;  %v2396_v62 = vmul.f32 0.2, %v2332_v6  ;;  %v2414_v11 = vsel %vm2382_vm6, %v2340_v2, %v2398_v5  ;;  %v2353_v15 = vadd.f32 %v3888_v9, %v4851_v42 }
 0x963   : > { %v2344_v10 = vpop.f32.mrf.mxu1  ;;  %v2426_v19 = vpack.c.bf16 %v2414_v11, %v2413_v17 }
 0x964   : > { %v2345_v12 = vadd.f32 %v4851_v42, %v2344_v10  ;;  %v2412_v14 = vsel %vm2380_vm9, %v2332_v6, %v2396_v62  ;;  %v2401_v25 = vmul.f32 0.2, %v2353_v15  ;;  %vm2385_vm12 = vcmp.gt.f32.partialorder %v2353_v15, 0.0 }
 0x965   : > { %v3889_v16 = vpop.f32.mrf.mxu1  ;;  %v2425_v7 = vpack.c.bf16 %v2412_v14, %v2411_v13 }
 0x966   : > { %v2356_v18 = vadd.f32 %v3889_v16, %v4851_v42  ;;  %v2399_v22 = vmul.f32 0.2, %v2345_v12  ;;  %vm2383_vm11 = vcmp.gt.f32.partialorder %v2345_v12, 0.0  ;;  %v2417_v33 = vsel %vm2385_vm12, %v2353_v15, %v2401_v25 }
 0x967   : > { %v2347_v21 = vpop.f32.mrf.mxu1  ;;  %3914 = vmatprep.mubr.bf16.mxu0 %v2425_v7 }
 0x968   : > { %vm2386_vm10 = vcmp.gt.f32.partialorder %v2356_v18, 0.0  ;;  %v2402_v23 = vmul.f32 0.2, %v2356_v18  ;;  %v2348_v24 = vadd.f32 %v4851_v42, %v2347_v21  ;;  %3915 = vmatmul.mubr.bf16.gmra.mxu0 %v2426_v19  ;;  %v2415_v20 = vsel %vm2383_vm11, %v2345_v12, %v2399_v22 }
 0x969   : > { %v3892_v26 = vpop.f32.mrf.mxu1 }
 0x96a   : > { %vm2384_vm13 = vcmp.gt.f32.partialorder %v2348_v24, 0.0  ;;  %v2400_v27 = vmul.f32 0.2, %v2348_v24  ;;  %v2418_v28 = vsel %vm2386_vm10, %v2356_v18, %v2402_v23  ;;  %v2369_v34 = vadd.f32 %v3892_v26, %v4851_v42 }
 0x96b   : > { %v2360_v30 = vpop.f32.mrf.mxu1  ;;  %v2428_v37 = vpack.c.bf16 %v2418_v28, %v2417_v33 }
 0x96c   : > { %v2361_v31 = vadd.f32 %v4851_v42, %v2360_v30  ;;  %v2416_v32 = vsel %vm2384_vm13, %v2348_v24, %v2400_v27  ;;  %v2405_v43 = vmul.f32 0.2, %v2369_v34  ;;  %vm2389_vm0 = vcmp.gt.f32.partialorder %v2369_v34, 0.0 }
 0x96d   : > { %v3893_v35 = vpop.f32.mrf.mxu1  ;;  %v2427_v36 = vpack.c.bf16 %v2416_v32, %v2415_v20 }
 0x96e   : > { %v2372_v38 = vadd.f32 %v3893_v35, %v4851_v42  ;;  %v2403_v39 = vmul.f32 0.2, %v2361_v31  ;;  %vm2387_vm15 = vcmp.gt.f32.partialorder %v2361_v31, 0.0  ;;  %v2421_v49 = vsel %vm2389_vm0, %v2369_v34, %v2405_v43 }
 0x96f   : > { %v2363_v29 = vpop.f32.mrf.mxu1  ;;  %3918 = vmatprep.mubr.bf16.mxu1 %v2427_v36 }
 0x970   : > { %vm2390_vm14 = vcmp.gt.f32.partialorder %v2372_v38, 0.0  ;;  %v2406_v40 = vmul.f32 0.2, %v2372_v38  ;;  %v2364_v41 = vadd.f32 %v4851_v42, %v2363_v29  ;;  %3919 = vmatmul.mubr.bf16.vlgmr.msra.gmra.mxu1 %v2428_v37  ;;  %v2419_v46 = vsel %vm2387_vm15, %v2361_v31, %v2403_v39 }
 0x972   : > { %vm2388_vm1 = vcmp.gt.f32.partialorder %v2364_v41, 0.0  ;;  %v2404_v44 = vmul.f32 0.2, %v2364_v41  ;;  %v2422_v45 = vsel %vm2390_vm14, %v2372_v38, %v2406_v40 }
 0x973   : > { %v2430_v50 = vpack.c.bf16 %v2422_v45, %v2421_v49 }
 0x974   : > { %v2420_v47 = vsel %vm2388_vm1, %v2364_v41, %v2404_v44 }
 0x975   : > { %v2429_v48 = vpack.c.bf16 %v2420_v47, %v2419_v46 }
 0x977   : > { %3922 = vmatprep.mubr.bf16.mxu1 %v2429_v48 }
 0x978   : > { %3923 = vmatmul.mubr.bf16.gmra.mxu1 %v2430_v50 }
 0xa20   : > { %v3912_v52 = vpop.f32.mrf.mxu0 }
 0xa21   : > { %v2545_v53 = vadd.f32 %v3912_v52, %v4870_v51 }
 0xa22   : > { %v2536_v42 = vpop.f32.mrf.mxu0 }
 0xa23   : > { %v2537_v54 = vadd.f32 %v4870_v51, %v2536_v42  ;;  %v2617_v55 = vmul.f32 0.2, %v2545_v53  ;;  %vm2601_vm2 = vcmp.gt.f32.partialorder %v2545_v53, 0.0 }
 0xa24   : > { %v3913_v56 = vpop.f32.mrf.mxu0 }
 0xa25   : > { %v2548_v57 = vadd.f32 %v3913_v56, %v4870_v51  ;;  %v2615_v59 = vmul.f32 0.2, %v2537_v54  ;;  %v2633_v63 = vsel %vm2601_vm2, %v2545_v53, %v2617_v55  ;;  %vm2599_vm4 = vcmp.gt.f32.partialorder %v2537_v54, 0.0 }
 0xa26   : > { %v2539_v58 = vpop.f32.mrf.mxu0 }
 0xa27   : > { %vm2602_vm3 = vcmp.gt.f32.partialorder %v2548_v57, 0.0  ;;  %v2618_v60 = vmul.f32 0.2, %v2548_v57  ;;  %v2540_v61 = vadd.f32 %v4870_v51, %v2539_v58  ;;  %v2631_v6 = vsel %vm2599_vm4, %v2537_v54, %v2615_v59 }
 0xa28   : > { %v3916_v0 = vpop.f32.mrf.mxu0 }
 0xa29   : > { %v2634_v1 = vsel %vm2602_vm3, %v2548_v57, %v2618_v60  ;;  %vm2600_vm5 = vcmp.gt.f32.partialorder %v2540_v61, 0.0  ;;  %v2616_v2 = vmul.f32 0.2, %v2540_v61  ;;  %v2561_v3 = vadd.f32 %v3916_v0, %v4870_v51 }
 0xa2a   : > { %v4877_v4 = vpack.c.bf16 %v2634_v1, %v2633_v63  ;;  %v2552_v5 = vpop.f32.mrf.mxu0 }
 0xa2b   : > { %v2632_v8 = vsel %vm2600_vm5, %v2540_v61, %v2616_v2  ;;  %v2553_v9 = vadd.f32 %v4870_v51, %v2552_v5  ;;  %v2621_v10 = vmul.f32 0.2, %v2561_v3  ;;  %vm2605_vm6 = vcmp.gt.f32.partialorder %v2561_v3, 0.0 }
 0xa2c   : > { %3411 = vst [vmem:[#allocation3 + $0x8] sm:$0xff] %v4877_v4   ;;  %v4881_v62 = vpack.c.bf16 %v2632_v8, %v2631_v6  ;;  %v3917_v11 = vpop.f32.mrf.mxu0 }
 0xa2d   : > { %v2564_v12 = vadd.f32 %v3917_v11, %v4870_v51  ;;  %v2619_v14 = vmul.f32 0.2, %v2553_v9  ;;  %v2637_v7 = vsel %vm2605_vm6, %v2561_v3, %v2621_v10  ;;  %vm2603_vm8 = vcmp.gt.f32.partialorder %v2553_v9, 0.0 }
 0xa2e   : > { %3361 = vst [vmem:[#allocation3] sm:$0xff] %v4881_v62   ;;  %v2555_v13 = vpop.f32.mrf.mxu0 }
 0xa2f   : > { %vm2606_vm7 = vcmp.gt.f32.partialorder %v2564_v12, 0.0  ;;  %v2622_v15 = vmul.f32 0.2, %v2564_v12  ;;  %v2556_v16 = vadd.f32 %v4870_v51, %v2555_v13  ;;  %v2635_v24 = vsel %vm2603_vm8, %v2553_v9, %v2619_v14 }
 0xa30   : > { %v3920_v17 = vpop.f32.mrf.mxu1 }
 0xa31   : > { %v2638_v18 = vsel %vm2606_vm7, %v2564_v12, %v2622_v15  ;;  %vm2604_vm9 = vcmp.gt.f32.partialorder %v2556_v16, 0.0  ;;  %v2620_v19 = vmul.f32 0.2, %v2556_v16  ;;  %v2577_v21 = vadd.f32 %v3920_v17, %v4870_v51 }
 0xa32   : > { %v4887_v22 = vpack.c.bf16 %v2638_v18, %v2637_v7  ;;  %v2568_v23 = vpop.f32.mrf.mxu1 }
 0xa33   : > { %v2636_v25 = vsel %vm2604_vm9, %v2556_v16, %v2620_v19  ;;  %v2569_v26 = vadd.f32 %v4870_v51, %v2568_v23  ;;  %v2625_v28 = vmul.f32 0.2, %v2577_v21  ;;  %vm2609_vm10 = vcmp.gt.f32.partialorder %v2577_v21, 0.0 }
 0xa34   : > { %3413 = vst [vmem:[#allocation3 + $0x18] sm:$0xff] %v4887_v22   ;;  %v2649_v27 = vpack.c.bf16 %v2636_v25, %v2635_v24  ;;  %v3921_v30 = vpop.f32.mrf.mxu1 }
 0xa35   : > { %v2580_v31 = vadd.f32 %v3921_v30, %v4870_v51  ;;  %v2623_v32 = vmul.f32 0.2, %v2569_v26  ;;  %v2641_v35 = vsel %vm2609_vm10, %v2577_v21, %v2625_v28  ;;  %vm2607_vm12 = vcmp.gt.f32.partialorder %v2569_v26, 0.0 }
 0xa36   : > { %3412 = vst [vmem:[#allocation3 + $0x10] sm:$0xff] %v2649_v27   ;;  %v2571_v20 = vpop.f32.mrf.mxu1 }
 0xa37   : > { %vm2610_vm11 = vcmp.gt.f32.partialorder %v2580_v31, 0.0  ;;  %v2626_v33 = vmul.f32 0.2, %v2580_v31  ;;  %v2572_v34 = vadd.f32 %v4870_v51, %v2571_v20  ;;  %v2639_v41 = vsel %vm2607_vm12, %v2569_v26, %v2623_v32 }
 0xa38   : > { %v3924_v36 = vpop.f32.mrf.mxu1 }
 0xa39   : > { %v2642_v37 = vsel %vm2610_vm11, %v2580_v31, %v2626_v33  ;;  %vm2608_vm13 = vcmp.gt.f32.partialorder %v2572_v34, 0.0  ;;  %v2624_v38 = vmul.f32 0.2, %v2572_v34  ;;  %v2593_v29 = vadd.f32 %v3924_v36, %v4870_v51 }
 0xa3a   : > { %v2652_v39 = vpack.c.bf16 %v2642_v37, %v2641_v35  ;;  %v2584_v40 = vpop.f32.mrf.mxu1 }
 0xa3b   : > { %v2640_v43 = vsel %vm2608_vm13, %v2572_v34, %v2624_v38  ;;  %v2585_v44 = vadd.f32 %v4870_v51, %v2584_v40  ;;  %v2629_v47 = vmul.f32 0.2, %v2593_v29  ;;  %vm2613_vm14 = vcmp.gt.f32.partialorder %v2593_v29, 0.0 }
 0xa3c   : > { %3415 = vst [vmem:[#allocation3 + $0x28] sm:$0xff] %v2652_v39   ;;  %v2651_v45 = vpack.c.bf16 %v2640_v43, %v2639_v41  ;;  %v3925_v46 = vpop.f32.mrf.mxu1 }
 0xa3d   : > { %v2596_v48 = vadd.f32 %v3925_v46, %v4870_v51  ;;  %v2627_v50 = vmul.f32 0.2, %v2585_v44  ;;  %vm2611_vm0 = vcmp.gt.f32.partialorder %v2585_v44, 0.0  ;;  %v2645_v42 = vsel %vm2613_vm14, %v2593_v29, %v2629_v47 }
 0xa3e   : > { %3414 = vst [vmem:[#allocation3 + $0x20] sm:$0xff] %v2651_v45   ;;  %v2587_v49 = vpop.f32.mrf.mxu1 }
 0xa3f   : > { %vm2614_vm15 = vcmp.gt.f32.partialorder %v2596_v48, 0.0  ;;  %v2630_v52 = vmul.f32 0.2, %v2596_v48  ;;  %v2588_v53 = vadd.f32 %v4870_v51, %v2587_v49  ;;  %v2643_v57 = vsel %vm2611_vm0, %v2585_v44, %v2627_v50 }
 0xa41   : > { %v2646_v54 = vsel %vm2614_vm15, %v2596_v48, %v2630_v52  ;;  %vm2612_vm1 = vcmp.gt.f32.partialorder %v2588_v53, 0.0  ;;  %v2628_v55 = vmul.f32 0.2, %v2588_v53 }
 0xa42   : > { %v2654_v56 = vpack.c.bf16 %v2646_v54, %v2645_v42  ;;  %2734 = sbr.rel (%p3210_p8) target bundleno = 2863 (0xb2f), region = 104 }
 0xa43   : > { %v2644_v58 = vsel %vm2612_vm1, %v2588_v53, %v2628_v55 }
 0xa44   : > { %3417 = vst [vmem:[#allocation3 + $0x38] sm:$0xff] %v2654_v56   ;;  %v2653_v59 = vpack.c.bf16 %v2644_v58, %v2643_v57 }
 0xa46   : > { %3416 = vst [vmem:[#allocation3 + $0x30] sm:$0xff] %v2653_v59  }
 0xa47   : > { %v4445_v60 = vmov 0.0   ;;  %vm4446_vm2 = vmmov 0   ;;  %v2736_v51 = vld [vmem:[%s4944_s6] sm:$0xf] }
 0xa48   : > { %3926 = vmatprep.subr.bf16.mxu0 %v4445_v60  ;;  %3942 = vmatprep.mubr.msk.bf16.mxu0 %vm4446_vm2, %v4445_v60  ;;  %v2735_v61 = vld [vmem:[#allocation4] sm:$0xff] }
 0xa49   : > { %3927 = vmatpush3.bf16.msra.mxu0 %v2654_v56 }
 0xa4a   : > { %3928 = vmatprep.subr.bf16.mxu0 %v4445_v60 }
 0xa4d   : > { %3929 = vmatpush3.bf16.msra.mxu0 %v2653_v59 }
 0xa4e   : > { %3930 = vmatprep.subr.bf16.mxu0 %v4445_v60 }
 0xa51   : > { %3931 = vmatpush3.bf16.msra.mxu0 %v2652_v39 }
 0xa52   : > { %3932 = vmatprep.subr.bf16.mxu0 %v4445_v60 }
 0xa55   : > { %3933 = vmatpush3.bf16.msra.mxu0 %v2651_v45 }
 0xa56   : > { %3934 = vmatprep.subr.bf16.mxu0 %v4445_v60 }
 0xa59   : > { %3935 = vmatpush3.bf16.msra.mxu0 %v4887_v22 }
 0xa5a   : > { %3936 = vmatprep.subr.bf16.mxu0 %v4445_v60 }
 0xa5d   : > { %3937 = vmatpush3.bf16.msra.mxu0 %v2649_v27 }
 0xa5e   : > { %3938 = vmatprep.subr.bf16.mxu0 %v4445_v60 }
 0xa61   : > { %3939 = vmatpush3.bf16.msra.mxu0 %v4877_v4 }
 0xa62   : > { %3940 = vmatprep.subr.bf16.mxu0 %v4445_v60 }
 0xa65   : > { %3941 = vmatpush3.bf16.msra.mxu0 %v4881_v62 }
 0xa68   : > { %3943 = vmatmul.mubr.bf16.vlgmr.msra.gmra.mxu0 %v2736_v51 }
 0xb28   : > { %v2771_v63 = vpop.f32.mrf.mxu0 }
 0xb29   : > { %v2777_v0 = vadd.f32 %v2771_v63, %v2735_v61 }
 0xb2a   : > { %v3944_v1 = vpop.f32.mrf.mxu0 }
 0xb2b   : > { %2778 = vst [vmem:[#allocation4] sm:$0xff] %v2777_v0 }
 0xb2c   : > { %v2774_v2 = vpop.f32.mrf.mxu0 }
 0xb2e   : > { %v3945_v3 = vpop.f32.mrf.mxu0 }
 0xb2f PF: > { %p2779_p12 = scmp.eq.s32.totalorder %s4421_s12, 1 }
 0xb30   : > { %v4197_v4 = vld [vmem:[#allocation12 + $0x38] sm:$0xff] (%p2779_p12)   ;;  %v4447_v5 = vmov (%p2779_p12), 0.0   ;;  %v4198_v6 = vld [vmem:[#allocation12 + $0x30] sm:$0xff] (%p2779_p12)   ;;  %vm4448_vm3 = vmmov (%p2779_p12), 0   ;;  %v4199_v8 = vld [vmem:[#allocation12 + $0x28] sm:$0xff] (%p2779_p12)   ;;  %s4983_s22 = sld [smem:[#allocation25_spill]] (%p2779_p12) }
 0xb31   : > { %2783 = sbr.rel (!%p2779_p12) target bundleno = 3096 (0xc18), region = 108  ;;  %3946 = vmatprep.subr.bf16.mxu0 (%p2779_p12), %v4447_v5  ;;  %3962 = vmatprep.mubr.msk.bf16.mxu0 (%p2779_p12), %vm4448_vm3, %v4447_v5  ;;  %v4200_v9 = vld [vmem:[#allocation12 + $0x20] sm:$0xff] (%p2779_p12)   ;;  %v4201_v62 = vld [vmem:[#allocation12 + $0x18] sm:$0xff] (%p2779_p12)   ;;  %v4202_v10 = vld [vmem:[#allocation12 + $0x10] sm:$0xff] (%p2779_p12)  }
 0xb32   : > { %3947 = vmatpush3.bf16.msra.mxu0 (%p2779_p12), %v4197_v4  ;;  %v4203_v11 = vld [vmem:[#allocation12 + $0x8] sm:$0xff] (%p2779_p12)   ;;  %v4204_v12 = vld [vmem:[#allocation12] sm:$0xff] (%p2779_p12)   ;;  %v2784_v13 = vld [vmem:[#allocation4] sm:$0xff] (%p2779_p12) }
 0xb33   : > { %3948 = vmatprep.subr.bf16.mxu0 (%p2779_p12), %v4447_v5  ;;  %v2785_v14 = vpack.c.bf16 (%p2779_p12), %v2784_v13, %v2784_v13 }
 0xb36   : > { %3949 = vmatpush3.bf16.msra.mxu0 %v4198_v6  ;;  %v3212_v15 = vld [vmem:[%s4983_s22] ss:$0 sm:$0xff] }
 0xb37   : > { %3950 = vmatprep.subr.bf16.mxu0 %v4447_v5 }
 0xb3a   : > { %3951 = vmatpush3.bf16.msra.mxu0 %v4199_v8 }
 0xb3b   : > { %3952 = vmatprep.subr.bf16.mxu0 %v4447_v5 }
 0xb3e   : > { %3953 = vmatpush3.bf16.msra.mxu0 %v4200_v9 }
 0xb3f   : > { %3954 = vmatprep.subr.bf16.mxu0 %v4447_v5 }
 0xb42   : > { %3955 = vmatpush3.bf16.msra.mxu0 %v4201_v62 }
 0xb43   : > { %3956 = vmatprep.subr.bf16.mxu0 %v4447_v5 }
 0xb46   : > { %3957 = vmatpush3.bf16.msra.mxu0 %v4202_v10 }
 0xb47   : > { %3958 = vmatprep.subr.bf16.mxu0 %v4447_v5 }
 0xb4a   : > { %3959 = vmatpush3.bf16.msra.mxu0 %v4203_v11 }
 0xb4b   : > { %3960 = vmatprep.subr.bf16.mxu0 %v4447_v5 }
 0xb4e   : > { %3961 = vmatpush3.bf16.msra.mxu0 %v4204_v12 }
 0xb51   : > { %3963 = vmatmul.mubr.bf16.vlgmr.msra.gmra.mxu0 %v2785_v14 }
 0xc11   : > { %v2891_v16 = vpop.f32.mrf.mxu0 }
 0xc12   : > { %v2892_v7 = vadd.f32 %v3212_v15, %v2891_v16 }
 0xc13   : > { %v3964_v17 = vpop.f32.mrf.mxu0 }
 0xc14   : > { %2897 = vst [vmem:[#allocation13] sm:$0xff] %v2892_v7 }
 0xc15   : > { %v2894_v18 = vpop.f32.mrf.mxu0 }
 0xc17   : > { %v3965_v19 = vpop.f32.mrf.mxu0 }
 0xc18 PF: > { %p4058_p1 = scmp.eq.s32.totalorder %s4529_s15, 1  ;;  %s4449_s19 = smov [#allocation13]  }
 0xc19   : > { %s2905_s25 = sshll.u32 %s4449_s19, 4  ;;  %s2906_s25 = int_to_ptr.vmem [resolvable:$true] %s2905_s25 }
 0xc1a   : > { %s4339_s24 = scalar_lea.vmem %s2906_s25, 128  ;;  %p4346_p3 = scmp.lt.s32.totalorder %s2906_s25, %s2906_s25 }
 0xc1b   : > { %p4340_p5 = scmp.ne.s32.totalorder %s2906_s25, %s4339_s24  ;;  %p4347_p9 = scmp.lt.s32.totalorder %s4339_s24, %s4339_s24 }
 0xc1d   : > { %p4341_p13 = pnand %p4340_p5, %p4058_p1  ;;  %p4348_p4 = por %p4347_p9, %p4346_p3 }
 0xc1f   : > { %p4342_p2 = pneg %p4341_p13 }
 0xc21   : > { %p4349_p10 = pnand %p4348_p4, %p4342_p2 }
 0xc23   : > { %4352 = shalt.err (!%p4349_p10)
}
 0xc24   : > { %s4984_s17 = sld [smem:[#allocation26_spill]] }
 0xc2a   : > { %4031 = dma.vmem_to_hbm [thread:$0]  (%p4058_p1), %s2906_s25, 128, %s4984_s17, [#allocation7]  }
 0xc2b   : > { %4404 = dma.done.wait (%p4058_p1), [#allocation7], 128  }
 0xc2c   : > { %4406 = vsyncadd (%p4058_p1), [#allocation7], 4294967168 }
 0xc2d PF: > { %s4985_s20 = sld [smem:[#allocation20_spill]]  ;;  %s4988_s30 = smov %s4413_s10 }
 0xc2e   : > { %s4986_s12 = sld [smem:[#allocation19_spill]]  ;;  %s4989_s10 = smov %s4417_s11 }
 0xc2f   : > { %s4987_s13 = sld [smem:[#allocation21_spill]]  ;;  %s4990_s11 = smov %s4619_s0 }
 0xc33   : > { %s22_s14 = sadd.s32 1, %s4985_s20  }
 0xc34   : > { %p19_p11 = scmp.ge.s32.totalorder %s22_s14, 4  }
 0xc36   :  { %21 = sbr.rel (!%p19_p11) target bundleno = 11 (0xb), region = 162 }
 0xc3b   :  { %2918 = vsyncpa [#allocation6], 1 }
 0xc3c   :  { %2920 = vsyncpa [#allocation6 + $0x1], 1 }
 0xc3d   :  { %2921 = vsyncpa [#allocation9], 1 }
 0xc3e   :  { %2922 = vsyncpa [#allocation7], 1 }
 0xc3f   :  { %2924 = vsyncpa [#allocation7 + $0x1], 1 }

</bundles_post_ra>
